<compile_context>
chip_gen: v6e
topology: v6e:2x2x1
jax: 0.10.0
libtpu: 0.0.40
codegen_flags: <defaults>
</compile_context>

<pallas_src>
import functools

import jax
import jax.numpy as jnp
from jax.experimental import pallas as pl
from jax.experimental.pallas import tpu as pltpu

IN_DIM = 6670          # roixroi.fc1 input features
HID = 100              # hidden width of fc1..fc4
LANE = 128
SUB = 16               # bf16 sublane packing: round batch rows to 16
MAX_BATCH_BLOCK = 256
MAX_CLASS_BLOCK = 512


def _round_up(x, m):
    return (x + m - 1) // m * m


def _cdiv(a, b):
    return (a + b - 1) // b


IN_PAD = _round_up(IN_DIM, LANE)    # 6784


def _folded_linear_kernel(x_ref, w_ref, b_ref, o_ref):
    """Single fused Linear: out = x_bf16 @ W_eff_bf16 (+ f32 bias), f32 MXU acc."""
    o_ref[...] = (jnp.dot(x_ref[...], w_ref[...],
                          preferred_element_type=jnp.float32) + b_ref[...])


def _choose_class_block(c_pad, max_block=MAX_CLASS_BLOCK):
    """Largest multiple of LANE that divides c_pad and is <= max_block."""
    best = LANE
    b = LANE
    limit = min(c_pad, max_block)
    while b <= limit:
        if c_pad % b == 0:
            best = b
        b += LANE
    return best


def _maybe_single_buffered(block_shape, index_map, single_buffer):
    """BlockSpec; single-buffered via pipeline_mode when operand is grid-invariant."""
    if single_buffer and hasattr(pl, "Buffered"):
        try:
            return pl.BlockSpec(block_shape, index_map,
                                pipeline_mode=pl.Buffered(1))
        except TypeError:   # older BlockSpec signature without pipeline_mode
            pass
    return pl.BlockSpec(block_shape, index_map)


def _vmem_limit_bytes(block_b, block_c):
    # Upper bound on the block footprint: assume double-buffering everywhere
    # (Buffered(1) on the invariant weight/bias only reduces the real usage).
    need = (2 * block_b * IN_PAD * 2      # x     (bf16)
            + 2 * IN_PAD * block_c * 2    # W_eff (bf16)
            + 2 * SUB * block_c * 4       # bias  (f32, sublane-padded)
            + 2 * block_b * block_c * 4)  # out   (f32)
    # Never declare less than the footprint; add headroom for Mosaic scratch.
    # The tile caps (256 rows x 6784, 512 lanes) keep this well under the
    # smallest per-TC VMEM (64 MiB on v7x).
    return int(max(need + (4 << 20), 16 << 20))


def prepare_params(params, num_classes):
    """Fold the all-linear chain into one weight/bias and pre-pad/cast to
    TPU-friendly shapes. Run ONCE, outside the jitted forward."""
    (w1, b1), (w2, b2), (w3, b3), (w4, b4), (wc, bc) = params
    # Weights are stored pre-transposed as (in_features, out_features).
    w_eff = w1 @ w2 @ w3 @ w4 @ wc                                 # (6670, C) f32
    b_eff = (((b1 @ w2 + b2) @ w3 + b3) @ w4 + b4) @ wc + bc       # (C,)     f32

    c_pad = _round_up(max(num_classes, LANE), LANE)
    # W_eff lives in bf16 (native MXU input; halves the dominant HBM traffic);
    # the bias stays f32 and is added after the f32-accumulated matmul.
    w_pad = jnp.zeros((IN_PAD, c_pad), jnp.bfloat16).at[
        :IN_DIM, :num_classes].set(w_eff.astype(jnp.bfloat16))
    b_pad = jnp.zeros((1, c_pad), jnp.float32).at[
        0, :num_classes].set(b_eff.astype(jnp.float32))
    return w_pad, b_pad


@functools.partial(jax.jit, static_argnames=("num_classes",))
def small_class_forward(fc_data, fmri_data, w_eff_pad, b_eff_pad, num_classes):
    """JAX/Pallas forward: roi linear chain (folded) -> class logits."""
    del fmri_data  # see TODO(synk) in the header: fmri path can't run as specced
    B = fc_data.shape[0]
    C_pad = w_eff_pad.shape[1]

    # Balanced batch blocks: padding waste is < one sublane group per block.
    nb = _cdiv(_round_up(max(B, SUB), SUB), MAX_BATCH_BLOCK)
    block_b = _round_up(_cdiv(B, nb), SUB)
    B_pad = nb * block_b

    # Class tiling so large class counts stay VMEM-resident per tile.
    block_c = _choose_class_block(C_pad)
    nc = C_pad // block_c
    weight_invariant = (nc == 1)

    # Zero-pad + f32->bf16 cast fused into one op; weights were pre-padded.
    x = jnp.zeros((B_pad, IN_PAD), jnp.bfloat16).at[:B, :IN_DIM].set(
        fc_data.astype(jnp.bfloat16))

    out_pad = pl.pallas_call(
        _folded_linear_kernel,
        out_shape=jax.ShapeDtypeStruct((B_pad, C_pad), jnp.float32),
        grid=(nb, nc),
        in_specs=[
            pl.BlockSpec((block_b, IN_PAD), lambda i, j: (i, 0)),     # x tile
            _maybe_single_buffered((IN_PAD, block_c), lambda i, j: (0, j),
                                   weight_invariant),                 # W_eff
            _maybe_single_buffered((1, block_c), lambda i, j: (0, j),
                                   weight_invariant),                 # bias
        ],
        out_specs=pl.BlockSpec((block_b, block_c), lambda i, j: (i, j)),
        compiler_params=pltpu.CompilerParams(
            dimension_semantics=("parallel", "parallel"),
            vmem_limit_bytes=_vmem_limit_bytes(block_b, block_c),
        ),
    )(x, w_eff_pad, b_eff_pad)

    return out_pad[:B, :num_classes]


def init_params(key, num_classes):
    """Deterministic parameter init (PyTorch Linear-style uniform bounds)."""
    def linear(k, fan_in, fan_out):
        kw, kb = jax.random.split(k)
        bound = 1.0 / jnp.sqrt(jnp.float32(fan_in))
        # stored as (in_features, out_features) == W^T
        w = jax.random.uniform(kw, (fan_in, fan_out), jnp.float32,
                               -bound, bound)
        b = jax.random.uniform(kb, (fan_out,), jnp.float32, -bound, bound)
        return w, b

    keys = jax.random.split(key, 5)
    return (
        linear(keys[0], IN_DIM, HID),       # fc1
        linear(keys[1], HID, HID),          # fc2
        linear(keys[2], HID, HID),          # fc3
        linear(keys[3], HID, HID),          # fc4
        linear(keys[4], HID, num_classes),  # classifier head
    )


def reference_forward(fc_data, params):
    """Pure-JAX f32 layer-by-layer reference (matches the PyTorch chain)."""
    x = fc_data.astype(jnp.float32)
    for (w, b) in params:
        x = x @ w + b
    return x


if __name__ == "__main__":
    num_classes = 4
    B = 2
    key = jax.random.PRNGKey(0)
    k_fc, k_fmri, k_par = jax.random.split(key, 3)

    fc_data = jax.random.normal(k_fc, (B, IN_DIM), jnp.float32)
    # fmri_data is an input of the original forward; small placeholder volume.
    fmri_data = jax.random.normal(k_fmri, (B, 61, 8, 8, 8), jnp.float32)
    params = init_params(k_par, num_classes)

    # One-time parameter preparation (fold + pad + bf16 cast), outside the jit.
    w_eff_pad, b_eff_pad = prepare_params(params, num_classes)
    w_eff_pad = jax.block_until_ready(w_eff_pad)
    b_eff_pad = jax.block_until_ready(b_eff_pad)

    out = small_class_forward(fc_data, fmri_data, w_eff_pad, b_eff_pad,
                              num_classes=num_classes)
    out = jax.block_until_ready(out)
    assert out.shape == (B, num_classes), out.shape

    # Tight check vs a bf16-consistent XLA reference (same dtypes / f32 acc).
    x_bf16 = jnp.zeros((B, IN_PAD), jnp.bfloat16).at[:, :IN_DIM].set(
        fc_data.astype(jnp.bfloat16))
    ref_bf16 = (jnp.dot(x_bf16, w_eff_pad,
                        preferred_element_type=jnp.float32)
                + b_eff_pad)[:, :num_classes]
    assert jnp.allclose(out, ref_bf16, atol=2e-3, rtol=2e-3), (
        "mismatch vs bf16-folded XLA reference")

    # Loose check vs the original f32 layer-by-layer chain (the gap is the
    # one-time bf16 rounding of W_eff and of the activation).
    ref = reference_forward(fc_data, params)
    assert jnp.allclose(out, ref, atol=2e-2, rtol=2e-2), (
        "mismatch vs pure-JAX layer-by-layer reference")

    print("KERNEL_OK")
</pallas_src>

<mosaic_0001>
module attributes {stable_mosaic.version = 11 : i64} {
  func.func @_folded_linear_kernel(%arg0: i32, %arg1: i32, %arg2: memref<16x6784xbf16, #tpu.memory_space<vmem>>, %arg3: memref<6784x128xbf16, #tpu.memory_space<vmem>>, %arg4: memref<1x128xf32, #tpu.memory_space<vmem>>, %arg5: memref<16x128xf32, #tpu.memory_space<vmem>>) attributes {dimension_semantics = [#tpu.dimension_semantics<parallel>, #tpu.dimension_semantics<parallel>], iteration_bounds = array<i64: 1, 1>, scalar_prefetch = 0 : i64, scratch_operands = 0 : i64, tpu.core_type = #tpu.core_type<tc>, window_params = [{transform_indices = @transform_0, window_bounds = array<i64: 16, 6784>}, {pipeline_mode = #tpu.pipeline_mode<synchronous>, transform_indices = @transform_1, window_bounds = array<i64: 6784, 128>}, {pipeline_mode = #tpu.pipeline_mode<synchronous>, transform_indices = @transform_2, window_bounds = array<i64: 1, 128>}, {transform_indices = @transform_3, window_bounds = array<i64: 16, 128>}]} {
    %c0 = arith.constant 0 : index
    %c0_0 = arith.constant 0 : index
    %0 = vector.load %arg2[%c0, %c0_0] : memref<16x6784xbf16, #tpu.memory_space<vmem>>, vector<16x6784xbf16>
    %c0_1 = arith.constant 0 : index
    %c0_2 = arith.constant 0 : index
    %1 = vector.load %arg3[%c0_1, %c0_2] : memref<6784x128xbf16, #tpu.memory_space<vmem>>, vector<6784x128xbf16>
    %cst = arith.constant dense<0.000000e+00> : vector<16x128xf32>
    %2 = tpu.matmul %0, %1, %cst {dimension_numbers = #tpu.dot_dimension_numbers<[1], [0], [0], [1], [0, 0, 1, 1], [], []>} : vector<16x6784xbf16>, vector<6784x128xbf16>, vector<16x128xf32> -> vector<16x128xf32>
    %c0_3 = arith.constant 0 : index
    %c0_4 = arith.constant 0 : index
    %3 = vector.load %arg4[%c0_3, %c0_4] : memref<1x128xf32, #tpu.memory_space<vmem>>, vector<1x128xf32>
    %4 = vector.broadcast %3 : vector<1x128xf32> to vector<16x128xf32>
    %5 = arith.addf %2, %4 : vector<16x128xf32>
    %c0_5 = arith.constant 0 : index
    %c0_6 = arith.constant 0 : index
    %6 = vector.load %arg5[%c0_5, %c0_6] : memref<16x128xf32, #tpu.memory_space<vmem>>, vector<16x128xf32>
    tpu.vector_store %arg5[%c0_5, %c0_6], %5 {strides = array<i32>} : memref<16x128xf32, #tpu.memory_space<vmem>>, vector<16x128xf32>,
    return
  }
  func.func @transform_0(%arg0: i32, %arg1: i32) -> (i32, i32) {
    %c0_i32 = arith.constant 0 : i32
    %c0_i32_0 = arith.constant 0 : i32
    return %arg0, %c0_i32 : i32, i32
  }
  func.func @transform_1(%arg0: i32, %arg1: i32) -> (i32, i32) {
    %c0_i32 = arith.constant 0 : i32
    %c0_i32_0 = arith.constant 0 : i32
    return %c0_i32, %arg1 : i32, i32
  }
  func.func @transform_2(%arg0: i32, %arg1: i32) -> (i32, i32) {
    %c0_i32 = arith.constant 0 : i32
    %c0_i32_0 = arith.constant 0 : i32
    return %c0_i32, %arg1 : i32, i32
  }
  func.func @transform_3(%arg0: i32, %arg1: i32) -> (i32, i32) {
    %c0_i32 = arith.constant 0 : i32
    return %arg0, %arg1 : i32, i32
  }
}

</mosaic_0001>

<bundles_post_ra>
// kernel: small_class_forward.1
= control target key start
LH: loop header
LB: loop body
LE: loop exit
PB: predicated region body
PF: predicated region fallthrough
CT: control target
= control target key end

     0   :  { %8 = vsyncpa [#allocation3], 0  ;;  %s6908_s0 = inlined_call_operand.vmem [shape: bf16[16,6784], index: 0, kind: input, shape index: {}]   ;;  %s6909_s1 = inlined_call_operand.hbm [shape: bf16[6784,128], index: 1, kind: input, shape index: {}]   ;;  %s6910_s2 = inlined_call_operand.hbm [shape: f32[1,128], index: 2, kind: input, shape index: {}]   ;;  %s6911_s3 = inlined_call_operand.vmem [shape: f32[16,128], index: 3, kind: output, shape index: {}]  }
   0x1   :  { %9 = vsyncpa [#allocation5], 0  ;;  %s6507_s12 = smov [#allocation2]  }
   0x2   :  { %s17_s13 = sshll.u32 %s6507_s12, 4  ;;  %s18_s13 = int_to_ptr.vmem [resolvable:$true] %s17_s13 }
   0x3   :  { %s6471_s14 = scalar_lea.vmem %s18_s13, 54272  ;;  %p6476_p1 = scmp.lt.s32.totalorder %s18_s13, %s18_s13 }
   0x4   :  { %p6472_p0 = scmp.ne.s32.totalorder %s18_s13, %s6471_s14  ;;  %p6477_p2 = scmp.lt.s32.totalorder %s6471_s14, %s6471_s14 }
   0x6   :  { %p6478_p3 = por %p6477_p2, %p6476_p1 }
   0x8   :  { %p6479_p4 = pnand %p6478_p3, %p6472_p0 }
   0xa   :  { %6482 = shalt.err (!%p6479_p4)
}
   0xb   :  { %s6508_s15 = smov 64   ;;  %s6509_s16 = smov 4  }
   0xc   :  { %23 = dma.hbm_to_vmem [thread:$0]  %s6909_s1, 54272, %s18_s13, [#allocation3], %s6508_s15, %s6508_s15, %s6509_s16  }
   0xd   :  { %s6510_s19 = smov [#allocation4]  }
   0xe   :  { %s30_s20 = sshll.u32 %s6510_s19, 4  ;;  %s31_s20 = int_to_ptr.vmem [resolvable:$true] %s30_s20 }
   0xf   :  { %s6491_s21 = scalar_lea.vmem %s31_s20, 16  ;;  %s6495_s22 = scalar_lea.vmem %s31_s20, 32 }
  0x10   :  { %p6492_p5 = scmp.ne.s32.totalorder %s31_s20, %s6491_s21  ;;  %p6496_p6 = scmp.lt.s32.totalorder %s31_s20, %s31_s20 }
  0x11   :  { %p6497_p7 = scmp.lt.s32.totalorder %s6495_s22, %s6491_s21 }
  0x13   :  { %p6498_p8 = por %p6497_p7, %p6496_p6 }
  0x15   :  { %p6499_p9 = pnand %p6498_p8, %p6492_p5 }
  0x17   :  { %6502 = shalt.err (!%p6499_p9)
}
  0x18   :  { %33 = dma.hbm_to_vmem [thread:$0]  %s6910_s2, 16, %s31_s20, [#allocation5]  }
  0x19   :  { %6503 = dma.done.wait [#allocation3], 54272  }
  0x1a   :  { %6504 = vsyncadd [#allocation3], 4294913024 }
  0x1b   :  { %6505 = dma.done.wait [#allocation5], 16  }
  0x1c   :  { %6506 = vsyncadd [#allocation5], 4294967280  ;;  %v5960_v0 = vld [vmem:[#allocation2 + $0x78] sm:$0xff]   ;;  %v5964_v4 = vld [vmem:[#allocation2 + $0x70] sm:$0xff]   ;;  %vm6512_vm0 = vmmov 0  }
  0x1d   :  { %v5961_v1 = vld [vmem:[#allocation2 + $0x38] sm:$0xff]   ;;  %5353 = vmatprep.subr.bf16.mxu0 %v5960_v0  ;;  %v5965_v5 = vld [vmem:[#allocation2 + $0x30] sm:$0xff]   ;;  %v5968_v8 = vld [vmem:[#allocation2 + $0x68] sm:$0xff]  }
  0x1e   :  { %v5962_v2 = vld [vmem:[#allocation2 + $0xf8] sm:$0xff]   ;;  %5354 = vmatpush3.bf16.msra.mxu0 %v5961_v1  ;;  %v5966_v6 = vld [vmem:[#allocation2 + $0xf0] sm:$0xff]   ;;  %v5969_v9 = vld [vmem:[#allocation2 + $0x28] sm:$0xff]  }
  0x1f   :  { %v5963_v3 = vld [vmem:[#allocation2 + $0xb8] sm:$0xff]   ;;  %5375 = vmatprep.subr.bf16.mxu1 %v5962_v2  ;;  %5355 = vmatprep.subr.bf16.mxu0 %v5964_v4  ;;  %v5967_v7 = vld [vmem:[#allocation2 + $0xb0] sm:$0xff]   ;;  %v5970_v10 = vld [vmem:[#allocation2 + $0xe8] sm:$0xff]  }
  0x20   :  { %5376 = vmatpush3.bf16.msra.mxu1 %v5963_v3  ;;  %v5971_v11 = vld [vmem:[#allocation2 + $0xa8] sm:$0xff]   ;;  %v5972_v12 = vld [vmem:[#allocation2 + $0x60] sm:$0xff]   ;;  %v5976_v16 = vld [vmem:[#allocation2 + $0x58] sm:$0xff]  }
  0x21   :  { %5377 = vmatprep.subr.bf16.mxu1 %v5966_v6  ;;  %v5973_v13 = vld [vmem:[#allocation2 + $0x20] sm:$0xff]   ;;  %v5977_v17 = vld [vmem:[#allocation2 + $0x18] sm:$0xff]   ;;  %v5980_v20 = vld [vmem:[#allocation2 + $0x50] sm:$0xff]  }
  0x22   :  { %5356 = vmatpush3.bf16.msra.mxu0 %v5965_v5  ;;  %v5974_v14 = vld [vmem:[#allocation2 + $0xe0] sm:$0xff]   ;;  %v5978_v18 = vld [vmem:[#allocation2 + $0xd8] sm:$0xff]   ;;  %v5981_v21 = vld [vmem:[#allocation2 + $0x10] sm:$0xff]  }
  0x23   :  { %5357 = vmatprep.subr.bf16.mxu0 %v5968_v8  ;;  %v5975_v15 = vld [vmem:[#allocation2 + $0xa0] sm:$0xff]   ;;  %v5979_v19 = vld [vmem:[#allocation2 + $0x98] sm:$0xff]   ;;  %v5982_v22 = vld [vmem:[#allocation2 + $0xd0] sm:$0xff]  }
  0x24   :  { %5378 = vmatpush3.bf16.msra.mxu1 %v5967_v7  ;;  %v5983_v23 = vld [vmem:[#allocation2 + $0x90] sm:$0xff]   ;;  %v5984_v24 = vld [vmem:[#allocation2 + $0x48] sm:$0xff]   ;;  %v5988_v28 = vld [vmem:[#allocation2 + $0x40] sm:$0xff]  }
  0x25   :  { %5379 = vmatprep.subr.bf16.mxu1 %v5970_v10  ;;  %v5985_v25 = vld [vmem:[#allocation2 + $0x8] sm:$0xff]   ;;  %v5989_v29 = vld [vmem:[#allocation2] sm:$0xff]   ;;  %v5995_v34 = vld [vmem:[#allocation2 + $0x178] sm:$0xff]  }
  0x26   :  { %5358 = vmatpush3.bf16.msra.mxu0 %v5969_v9  ;;  %v5986_v26 = vld [vmem:[#allocation2 + $0xc8] sm:$0xff]   ;;  %v5990_v30 = vld [vmem:[#allocation2 + $0xc0] sm:$0xff]   ;;  %v5999_v37 = vld [vmem:[#allocation2 + $0x138] sm:$0xff]  }
  0x27   :  { %5359 = vmatprep.subr.bf16.mxu0 %v5972_v12  ;;  %v5987_v27 = vld [vmem:[#allocation2 + $0x88] sm:$0xff]   ;;  %v5991_v31 = vld [vmem:[%s6908_s0] ss:$212 sps:$4 sm:$0xff]   ;;  %v5993_v32 = vld [vmem:[%s6908_s0 + $0x4] ss:$212 sps:$4 sm:$0xff]  }
  0x28   :  { %5380 = vmatpush3.bf16.msra.mxu1 %v5971_v11  ;;  %v5994_v33 = vld [vmem:[#allocation2 + $0x80] sm:$0xff]   ;;  %3792 = vmatprep.mubr.bf16.mxu0 %v5993_v32  ;;  %v5996_v35 = vld [vmem:[%s6908_s0 + $0x8] ss:$212 sps:$4 sm:$0xff]   ;;  %v6002_v40 = vld [vmem:[#allocation2 + $0x170] sm:$0xff]  }
  0x29   :  { %5381 = vmatprep.subr.bf16.mxu1 %v5974_v14  ;;  %v5998_v36 = vld [vmem:[%s6908_s0 + $0xc] ss:$212 sps:$4 sm:$0xff]   ;;  %v6000_v38 = vld [vmem:[#allocation2 + $0x1f8] sm:$0xff]   ;;  %v6003_v41 = vld [vmem:[#allocation2 + $0x130] sm:$0xff]  }
  0x2a   :  { %5360 = vmatpush3.bf16.msra.mxu0 %v5973_v13  ;;  %3833 = vmatprep.mubr.bf16.mxu1 %v5998_v36  ;;  %v6001_v39 = vld [vmem:[#allocation2 + $0x1b8] sm:$0xff]   ;;  %v6004_v42 = vld [vmem:[#allocation2 + $0x1f0] sm:$0xff]   ;;  %v6006_v44 = vld [vmem:[#allocation2 + $0x168] sm:$0xff]  }
  0x2b   :  { %5361 = vmatprep.subr.bf16.mxu0 %v5976_v16  ;;  %v6005_v43 = vld [vmem:[#allocation2 + $0x1b0] sm:$0xff]   ;;  %v6007_v45 = vld [vmem:[#allocation2 + $0x128] sm:$0xff]   ;;  %v6010_v48 = vld [vmem:[#allocation2 + $0x160] sm:$0xff]  }
  0x2c   :  { %5382 = vmatpush3.bf16.msra.mxu1 %v5975_v15  ;;  %v6008_v46 = vld [vmem:[#allocation2 + $0x1e8] sm:$0xff]   ;;  %v6011_v49 = vld [vmem:[#allocation2 + $0x120] sm:$0xff]   ;;  %v6014_v52 = vld [vmem:[#allocation2 + $0x158] sm:$0xff]  }
  0x2d   :  { %5383 = vmatprep.subr.bf16.mxu1 %v5978_v18  ;;  %v6009_v47 = vld [vmem:[#allocation2 + $0x1a8] sm:$0xff]   ;;  %v6012_v50 = vld [vmem:[#allocation2 + $0x1e0] sm:$0xff]   ;;  %v6015_v53 = vld [vmem:[#allocation2 + $0x118] sm:$0xff]  }
  0x2e   :  { %5362 = vmatpush3.bf16.msra.mxu0 %v5977_v17  ;;  %v6013_v51 = vld [vmem:[#allocation2 + $0x1a0] sm:$0xff]   ;;  %v6016_v54 = vld [vmem:[#allocation2 + $0x1d8] sm:$0xff]   ;;  %v6018_v56 = vld [vmem:[#allocation2 + $0x150] sm:$0xff]  }
  0x2f   :  { %5363 = vmatprep.subr.bf16.mxu0 %v5980_v20  ;;  %v6017_v55 = vld [vmem:[#allocation2 + $0x198] sm:$0xff]   ;;  %v6019_v57 = vld [vmem:[#allocation2 + $0x110] sm:$0xff]   ;;  %v6022_v60 = vld [vmem:[#allocation2 + $0x148] sm:$0xff]  }
  0x30   :  { %5384 = vmatpush3.bf16.msra.mxu1 %v5979_v19  ;;  %v6020_v58 = vld [vmem:[#allocation2 + $0x1d0] sm:$0xff]   ;;  %v6023_v61 = vld [vmem:[#allocation2 + $0x108] sm:$0xff]   ;;  %v6026_v0 = vld [vmem:[#allocation2 + $0x140] sm:$0xff]  }
  0x31   :  { %5385 = vmatprep.subr.bf16.mxu1 %v5982_v22  ;;  %v6021_v59 = vld [vmem:[#allocation2 + $0x190] sm:$0xff]   ;;  %v6024_v62 = vld [vmem:[#allocation2 + $0x1c8] sm:$0xff]   ;;  %v6027_v1 = vld [vmem:[#allocation2 + $0x100] sm:$0xff]  }
  0x32   :  { %5364 = vmatpush3.bf16.msra.mxu0 %v5981_v21  ;;  %v6025_v63 = vld [vmem:[#allocation2 + $0x188] sm:$0xff]   ;;  %v6028_v2 = vld [vmem:[#allocation2 + $0x1c0] sm:$0xff]   ;;  %v6033_v6 = vld [vmem:[#allocation2 + $0x278] sm:$0xff]  }
  0x33   :  { %5365 = vmatprep.subr.bf16.mxu0 %v5984_v24  ;;  %v6029_v3 = vld [vmem:[%s6908_s0 + $0x10] ss:$212 sps:$4 sm:$0xff]   ;;  %v6031_v4 = vld [vmem:[%s6908_s0 + $0x14] ss:$212 sps:$4 sm:$0xff]   ;;  %v6034_v7 = vld [vmem:[%s6908_s0 + $0x18] ss:$212 sps:$4 sm:$0xff]  }
  0x34   :  { %5386 = vmatpush3.bf16.msra.mxu1 %v5983_v23  ;;  %v6032_v5 = vld [vmem:[#allocation2 + $0x180] sm:$0xff]   ;;  %v6036_v8 = vld [vmem:[%s6908_s0 + $0x1c] ss:$212 sps:$4 sm:$0xff]   ;;  %v6044_v16 = vld [vmem:[#allocation2 + $0x268] sm:$0xff]  }
  0x35   :  { %5387 = vmatprep.subr.bf16.mxu1 %v5986_v26  ;;  %v6037_v9 = vld [vmem:[#allocation2 + $0x238] sm:$0xff]   ;;  %v6040_v12 = vld [vmem:[#allocation2 + $0x270] sm:$0xff]   ;;  %v6045_v17 = vld [vmem:[#allocation2 + $0x228] sm:$0xff]  }
  0x36   :  { %5366 = vmatpush3.bf16.msra.mxu0 %v5985_v25  ;;  %v6038_v10 = vld [vmem:[#allocation2 + $0x2f8] sm:$0xff]   ;;  %v6041_v13 = vld [vmem:[#allocation2 + $0x230] sm:$0xff]   ;;  %v6046_v18 = vld [vmem:[#allocation2 + $0x2e8] sm:$0xff]  }
  0x37   :  { %5367 = vmatprep.subr.bf16.mxu0 %v5988_v28  ;;  %v6039_v11 = vld [vmem:[#allocation2 + $0x2b8] sm:$0xff]   ;;  %v6042_v14 = vld [vmem:[#allocation2 + $0x2f0] sm:$0xff]   ;;  %v6047_v19 = vld [vmem:[#allocation2 + $0x2a8] sm:$0xff]  }
  0x38   :  { %5388 = vmatpush3.bf16.msra.mxu1 %v5987_v27  ;;  %v6043_v15 = vld [vmem:[#allocation2 + $0x2b0] sm:$0xff]   ;;  %v6048_v20 = vld [vmem:[#allocation2 + $0x260] sm:$0xff]   ;;  %v6052_v24 = vld [vmem:[#allocation2 + $0x258] sm:$0xff]  }
  0x39   :  { %5389 = vmatprep.subr.bf16.mxu1 %v5990_v30  ;;  %v6049_v21 = vld [vmem:[#allocation2 + $0x220] sm:$0xff]   ;;  %v6053_v25 = vld [vmem:[#allocation2 + $0x218] sm:$0xff]   ;;  %v6056_v28 = vld [vmem:[#allocation2 + $0x250] sm:$0xff]  }
  0x3a   :  { %5368 = vmatpush3.bf16.msra.mxu0 %v5989_v29  ;;  %v6050_v22 = vld [vmem:[#allocation2 + $0x2e0] sm:$0xff]   ;;  %v6054_v26 = vld [vmem:[#allocation2 + $0x2d8] sm:$0xff]   ;;  %v6057_v29 = vld [vmem:[#allocation2 + $0x210] sm:$0xff]  }
  0x3b   :  { %5397 = vmatprep.subr.bf16.mxu0 %v5995_v34  ;;  %v6051_v23 = vld [vmem:[#allocation2 + $0x2a0] sm:$0xff]   ;;  %v6055_v27 = vld [vmem:[#allocation2 + $0x298] sm:$0xff]   ;;  %v6058_v30 = vld [vmem:[#allocation2 + $0x2d0] sm:$0xff]  }
  0x3c   :  { %5390 = vmatpush3.bf16.msra.mxu1 %v5994_v33  ;;  %v6060_v32 = vld [vmem:[#allocation2 + $0x248] sm:$0xff]   ;;  %v6064_v36 = vld [vmem:[#allocation2 + $0x240] sm:$0xff]  }
  0x3d   :  { %3793 = vmatmul.mubr.bf16.vlgmr.msra.gmra.mxu0 %v5991_v31  ;;  %5419 = vmatprep.subr.bf16.mxu1 %v6000_v38  ;;  %v6059_v31 = vld [vmem:[#allocation2 + $0x290] sm:$0xff]   ;;  %v6061_v33 = vld [vmem:[#allocation2 + $0x208] sm:$0xff]   ;;  %v6066_v38 = vld [vmem:[#allocation2 + $0x2c0] sm:$0xff]  }
  0x3e   :  { %5398 = vmatpush3.bf16.msra.mxu0 %v5999_v37  ;;  %3874 = vmatprep.mubr.bf16.mxu0 %v6031_v4  ;;  %v6062_v34 = vld [vmem:[#allocation2 + $0x2c8] sm:$0xff]   ;;  %v6065_v37 = vld [vmem:[#allocation2 + $0x200] sm:$0xff]  }
  0x3f   :  { %3834 = vmatmul.mubr.bf16.vlgmr.msra.gmra.mxu1 %v5996_v35  ;;  %5399 = vmatprep.subr.bf16.mxu0 %v6002_v40  ;;  %v6063_v35 = vld [vmem:[#allocation2 + $0x288] sm:$0xff]   ;;  %v6069_v40 = vld [vmem:[%s6908_s0 + $0x24] ss:$212 sps:$4 sm:$0xff]  }
  0x40   :  { %5420 = vmatpush3.bf16.msra.mxu1 %v6001_v39  ;;  %3915 = vmatprep.mubr.bf16.mxu1 %v6036_v8  ;;  %v6067_v39 = vld [vmem:[%s6908_s0 + $0x20] ss:$212 sps:$4 sm:$0xff]   ;;  %v6098_v4 = vld [vmem:[#allocation2 + $0x348] sm:$0xff]  }
  0x41   :  { %5421 = vmatprep.subr.bf16.mxu1 %v6004_v42  ;;  %v6071_v42 = vld [vmem:[#allocation2 + $0x378] sm:$0xff]   ;;  %v6102_v8 = vld [vmem:[#allocation2 + $0x340] sm:$0xff]  }
  0x42   :  { %5400 = vmatpush3.bf16.msra.mxu0 %v6003_v41  ;;  %v6070_v41 = vld [vmem:[#allocation2 + $0x280] sm:$0xff]  }
  0x43   :  { %5401 = vmatprep.subr.bf16.mxu0 %v6006_v44  ;;  %v6074_v44 = vld [vmem:[%s6908_s0 + $0x2c] ss:$212 sps:$4 sm:$0xff]  }
  0x44   :  { %5422 = vmatpush3.bf16.msra.mxu1 %v6005_v43  ;;  %v6072_v43 = vld [vmem:[%s6908_s0 + $0x28] ss:$212 sps:$4 sm:$0xff]  }
  0x45   :  { %5423 = vmatprep.subr.bf16.mxu1 %v6008_v46  ;;  %v6076_v46 = vld [vmem:[#allocation2 + $0x3f8] sm:$0xff]  }
  0x46   :  { %5402 = vmatpush3.bf16.msra.mxu0 %v6007_v45  ;;  %v6075_v45 = vld [vmem:[#allocation2 + $0x338] sm:$0xff]  }
  0x47   :  { %5403 = vmatprep.subr.bf16.mxu0 %v6010_v48  ;;  %v6078_v48 = vld [vmem:[#allocation2 + $0x370] sm:$0xff]  }
  0x48   :  { %5424 = vmatpush3.bf16.msra.mxu1 %v6009_v47  ;;  %v6077_v47 = vld [vmem:[#allocation2 + $0x3b8] sm:$0xff]  }
  0x49   :  { %5425 = vmatprep.subr.bf16.mxu1 %v6012_v50  ;;  %v6080_v50 = vld [vmem:[#allocation2 + $0x3f0] sm:$0xff]  }
  0x4a   :  { %5404 = vmatpush3.bf16.msra.mxu0 %v6011_v49  ;;  %v6079_v49 = vld [vmem:[#allocation2 + $0x330] sm:$0xff]  }
  0x4b   :  { %5405 = vmatprep.subr.bf16.mxu0 %v6014_v52  ;;  %v6082_v52 = vld [vmem:[#allocation2 + $0x368] sm:$0xff]  }
  0x4c   :  { %5426 = vmatpush3.bf16.msra.mxu1 %v6013_v51  ;;  %v6081_v51 = vld [vmem:[#allocation2 + $0x3b0] sm:$0xff]  }
  0x4d   :  { %5427 = vmatprep.subr.bf16.mxu1 %v6016_v54  ;;  %v6084_v54 = vld [vmem:[#allocation2 + $0x3e8] sm:$0xff]  }
  0x4e   :  { %5406 = vmatpush3.bf16.msra.mxu0 %v6015_v53  ;;  %v6083_v53 = vld [vmem:[#allocation2 + $0x328] sm:$0xff]  }
  0x4f   :  { %5407 = vmatprep.subr.bf16.mxu0 %v6018_v56  ;;  %v6086_v56 = vld [vmem:[#allocation2 + $0x360] sm:$0xff]  }
  0x50   :  { %5428 = vmatpush3.bf16.msra.mxu1 %v6017_v55  ;;  %v6085_v55 = vld [vmem:[#allocation2 + $0x3a8] sm:$0xff]  }
  0x51   :  { %5429 = vmatprep.subr.bf16.mxu1 %v6020_v58  ;;  %v6088_v58 = vld [vmem:[#allocation2 + $0x3e0] sm:$0xff]  }
  0x52   :  { %5408 = vmatpush3.bf16.msra.mxu0 %v6019_v57  ;;  %v6087_v57 = vld [vmem:[#allocation2 + $0x320] sm:$0xff]  }
  0x53   :  { %5409 = vmatprep.subr.bf16.mxu0 %v6022_v60  ;;  %v6090_v60 = vld [vmem:[#allocation2 + $0x358] sm:$0xff]  }
  0x54   :  { %5430 = vmatpush3.bf16.msra.mxu1 %v6021_v59  ;;  %v6089_v59 = vld [vmem:[#allocation2 + $0x3a0] sm:$0xff]  }
  0x55   :  { %5431 = vmatprep.subr.bf16.mxu1 %v6024_v62  ;;  %v6092_v62 = vld [vmem:[#allocation2 + $0x3d8] sm:$0xff]  }
  0x56   :  { %5410 = vmatpush3.bf16.msra.mxu0 %v6023_v61  ;;  %v6091_v61 = vld [vmem:[#allocation2 + $0x318] sm:$0xff]  }
  0x57   :  { %5411 = vmatprep.subr.bf16.mxu0 %v6026_v0  ;;  %v6094_v0 = vld [vmem:[#allocation2 + $0x350] sm:$0xff]  }
  0x58   :  { %5432 = vmatpush3.bf16.msra.mxu1 %v6025_v63  ;;  %v6093_v63 = vld [vmem:[#allocation2 + $0x398] sm:$0xff]  }
  0x59   :  { %5433 = vmatprep.subr.bf16.mxu1 %v6028_v2  ;;  %v6096_v2 = vld [vmem:[#allocation2 + $0x3d0] sm:$0xff]  }
  0x5a   :  { %5412 = vmatpush3.bf16.msra.mxu0 %v6027_v1  ;;  %v6095_v1 = vld [vmem:[#allocation2 + $0x310] sm:$0xff]  }
  0x5b   :  { %5441 = vmatprep.subr.bf16.mxu0 %v6033_v6  ;;  %v6100_v6 = vld [vmem:[#allocation2 + $0x3c8] sm:$0xff]  }
  0x5c   :  { %5434 = vmatpush3.bf16.msra.mxu1 %v6032_v5  ;;  %v6099_v5 = vld [vmem:[#allocation2 + $0x308] sm:$0xff]  }
  0x5d   :  { %3875 = vmatmul.mubr.bf16.vlgmr.msra.gmra.mxu0 %v6029_v3  ;;  %5463 = vmatprep.subr.bf16.mxu1 %v6038_v10  ;;  %v6097_v3 = vld [vmem:[#allocation2 + $0x390] sm:$0xff]   ;;  %v6104_v10 = vld [vmem:[#allocation2 + $0x3c0] sm:$0xff]  }
  0x5e   :  { %5442 = vmatpush3.bf16.msra.mxu0 %v6037_v9  ;;  %3956 = vmatprep.mubr.bf16.mxu0 %v6069_v40  ;;  %v6103_v9 = vld [vmem:[#allocation2 + $0x300] sm:$0xff]   ;;  %v6136_v40 = vld [vmem:[#allocation2 + $0x448] sm:$0xff]  }
  0x5f   :  { %3916 = vmatmul.mubr.bf16.vlgmr.msra.gmra.mxu1 %v6034_v7  ;;  %5443 = vmatprep.subr.bf16.mxu0 %v6040_v12  ;;  %v6101_v7 = vld [vmem:[#allocation2 + $0x388] sm:$0xff]  }
  0x60   :  { %5464 = vmatpush3.bf16.msra.mxu1 %v6039_v11  ;;  %3997 = vmatprep.mubr.bf16.mxu1 %v6074_v44  ;;  %v6105_v11 = vld [vmem:[%s6908_s0 + $0x30] ss:$212 sps:$4 sm:$0xff]   ;;  %v6107_v12 = vld [vmem:[%s6908_s0 + $0x34] ss:$212 sps:$4 sm:$0xff]  }
  0x61   :  { %5465 = vmatprep.subr.bf16.mxu1 %v6042_v14  ;;  %v6109_v14 = vld [vmem:[#allocation2 + $0x478] sm:$0xff]   ;;  %v6140_v44 = vld [vmem:[#allocation2 + $0x440] sm:$0xff]  }
  0x62   :  { %5444 = vmatpush3.bf16.msra.mxu0 %v6041_v13  ;;  %v6108_v13 = vld [vmem:[#allocation2 + $0x380] sm:$0xff]  }
  0x63   :  { %5445 = vmatprep.subr.bf16.mxu0 %v6044_v16  ;;  %v6112_v16 = vld [vmem:[%s6908_s0 + $0x3c] ss:$212 sps:$4 sm:$0xff]  }
  0x64   :  { %5466 = vmatpush3.bf16.msra.mxu1 %v6043_v15  ;;  %v6110_v15 = vld [vmem:[%s6908_s0 + $0x38] ss:$212 sps:$4 sm:$0xff]  }
  0x65   :  { %5467 = vmatprep.subr.bf16.mxu1 %v6046_v18  ;;  %v6114_v18 = vld [vmem:[#allocation2 + $0x4f8] sm:$0xff]  }
  0x66   :  { %5446 = vmatpush3.bf16.msra.mxu0 %v6045_v17  ;;  %v6113_v17 = vld [vmem:[#allocation2 + $0x438] sm:$0xff]  }
  0x67   :  { %5447 = vmatprep.subr.bf16.mxu0 %v6048_v20  ;;  %v6116_v20 = vld [vmem:[#allocation2 + $0x470] sm:$0xff]  }
  0x68   :  { %5468 = vmatpush3.bf16.msra.mxu1 %v6047_v19  ;;  %v6115_v19 = vld [vmem:[#allocation2 + $0x4b8] sm:$0xff]  }
  0x69   :  { %5469 = vmatprep.subr.bf16.mxu1 %v6050_v22  ;;  %v6118_v22 = vld [vmem:[#allocation2 + $0x4f0] sm:$0xff]  }
  0x6a   :  { %5448 = vmatpush3.bf16.msra.mxu0 %v6049_v21  ;;  %v6117_v21 = vld [vmem:[#allocation2 + $0x430] sm:$0xff]  }
  0x6b   :  { %5449 = vmatprep.subr.bf16.mxu0 %v6052_v24  ;;  %v6120_v24 = vld [vmem:[#allocation2 + $0x468] sm:$0xff]  }
  0x6c   :  { %5470 = vmatpush3.bf16.msra.mxu1 %v6051_v23  ;;  %v6119_v23 = vld [vmem:[#allocation2 + $0x4b0] sm:$0xff]  }
  0x6d   :  { %5471 = vmatprep.subr.bf16.mxu1 %v6054_v26  ;;  %v6122_v26 = vld [vmem:[#allocation2 + $0x4e8] sm:$0xff]  }
  0x6e   :  { %5450 = vmatpush3.bf16.msra.mxu0 %v6053_v25  ;;  %v6121_v25 = vld [vmem:[#allocation2 + $0x428] sm:$0xff]  }
  0x6f   :  { %5451 = vmatprep.subr.bf16.mxu0 %v6056_v28  ;;  %v6124_v28 = vld [vmem:[#allocation2 + $0x460] sm:$0xff]  }
  0x70   :  { %5472 = vmatpush3.bf16.msra.mxu1 %v6055_v27  ;;  %v6123_v27 = vld [vmem:[#allocation2 + $0x4a8] sm:$0xff]  }
  0x71   :  { %5473 = vmatprep.subr.bf16.mxu1 %v6058_v30  ;;  %v6126_v30 = vld [vmem:[#allocation2 + $0x4e0] sm:$0xff]  }
  0x72   :  { %5452 = vmatpush3.bf16.msra.mxu0 %v6057_v29  ;;  %v6125_v29 = vld [vmem:[#allocation2 + $0x420] sm:$0xff]  }
  0x73   :  { %5453 = vmatprep.subr.bf16.mxu0 %v6060_v32  ;;  %v6128_v32 = vld [vmem:[#allocation2 + $0x458] sm:$0xff]  }
  0x74   :  { %5474 = vmatpush3.bf16.msra.mxu1 %v6059_v31  ;;  %v6127_v31 = vld [vmem:[#allocation2 + $0x4a0] sm:$0xff]  }
  0x75   :  { %5475 = vmatprep.subr.bf16.mxu1 %v6062_v34  ;;  %v6130_v34 = vld [vmem:[#allocation2 + $0x4d8] sm:$0xff]  }
  0x76   :  { %5454 = vmatpush3.bf16.msra.mxu0 %v6061_v33  ;;  %v6129_v33 = vld [vmem:[#allocation2 + $0x418] sm:$0xff]  }
  0x77   :  { %5455 = vmatprep.subr.bf16.mxu0 %v6064_v36  ;;  %v6132_v36 = vld [vmem:[#allocation2 + $0x450] sm:$0xff]  }
  0x78   :  { %5476 = vmatpush3.bf16.msra.mxu1 %v6063_v35  ;;  %v6131_v35 = vld [vmem:[#allocation2 + $0x498] sm:$0xff]  }
  0x79   :  { %5477 = vmatprep.subr.bf16.mxu1 %v6066_v38  ;;  %v6134_v38 = vld [vmem:[#allocation2 + $0x4d0] sm:$0xff]  }
  0x7a   :  { %5456 = vmatpush3.bf16.msra.mxu0 %v6065_v37  ;;  %v6133_v37 = vld [vmem:[#allocation2 + $0x410] sm:$0xff]  }
  0x7b   :  { %5485 = vmatprep.subr.bf16.mxu0 %v6071_v42  ;;  %v6138_v42 = vld [vmem:[#allocation2 + $0x4c8] sm:$0xff]  }
  0x7c   :  { %5478 = vmatpush3.bf16.msra.mxu1 %v6070_v41  ;;  %v6137_v41 = vld [vmem:[#allocation2 + $0x408] sm:$0xff]  }
  0x7d   :  { %3957 = vmatmul.mubr.bf16.vlgmr.msra.gmra.mxu0 %v6067_v39  ;;  %5507 = vmatprep.subr.bf16.mxu1 %v6076_v46  ;;  %v6135_v39 = vld [vmem:[#allocation2 + $0x490] sm:$0xff]   ;;  %v6142_v46 = vld [vmem:[#allocation2 + $0x4c0] sm:$0xff]  }
  0x7e   :  { %5486 = vmatpush3.bf16.msra.mxu0 %v6075_v45  ;;  %4038 = vmatprep.mubr.bf16.mxu0 %v6107_v12  ;;  %v6141_v45 = vld [vmem:[#allocation2 + $0x400] sm:$0xff]   ;;  %v6174_v12 = vld [vmem:[#allocation2 + $0x548] sm:$0xff]  }
  0x7f   :  { %3998 = vmatmul.mubr.bf16.vlgmr.msra.gmra.mxu1 %v6072_v43  ;;  %5487 = vmatprep.subr.bf16.mxu0 %v6078_v48  ;;  %v6139_v43 = vld [vmem:[#allocation2 + $0x488] sm:$0xff]   ;;  %v6145_v48 = vld [vmem:[%s6908_s0 + $0x44] ss:$212 sps:$4 sm:$0xff]  }
  0x80   :  { %5508 = vmatpush3.bf16.msra.mxu1 %v6077_v47  ;;  %4079 = vmatprep.mubr.bf16.mxu1 %v6112_v16  ;;  %v6143_v47 = vld [vmem:[%s6908_s0 + $0x40] ss:$212 sps:$4 sm:$0xff]  }
  0x81   :  { %5509 = vmatprep.subr.bf16.mxu1 %v6080_v50  ;;  %v6147_v50 = vld [vmem:[#allocation2 + $0x578] sm:$0xff]   ;;  %v6178_v16 = vld [vmem:[#allocation2 + $0x540] sm:$0xff]  }
  0x82   :  { %5488 = vmatpush3.bf16.msra.mxu0 %v6079_v49  ;;  %v6146_v49 = vld [vmem:[#allocation2 + $0x480] sm:$0xff]  }
  0x83   :  { %5489 = vmatprep.subr.bf16.mxu0 %v6082_v52  ;;  %v6150_v52 = vld [vmem:[%s6908_s0 + $0x4c] ss:$212 sps:$4 sm:$0xff]  }
  0x84   :  { %5510 = vmatpush3.bf16.msra.mxu1 %v6081_v51  ;;  %v6148_v51 = vld [vmem:[%s6908_s0 + $0x48] ss:$212 sps:$4 sm:$0xff]  }
  0x85   :  { %5511 = vmatprep.subr.bf16.mxu1 %v6084_v54  ;;  %v6152_v54 = vld [vmem:[#allocation2 + $0x5f8] sm:$0xff]  }
  0x86   :  { %5490 = vmatpush3.bf16.msra.mxu0 %v6083_v53  ;;  %v6151_v53 = vld [vmem:[#allocation2 + $0x538] sm:$0xff]  }
  0x87   :  { %5491 = vmatprep.subr.bf16.mxu0 %v6086_v56  ;;  %v6154_v56 = vld [vmem:[#allocation2 + $0x570] sm:$0xff]  }
  0x88   :  { %5512 = vmatpush3.bf16.msra.mxu1 %v6085_v55  ;;  %v6153_v55 = vld [vmem:[#allocation2 + $0x5b8] sm:$0xff]  }
  0x89   :  { %5513 = vmatprep.subr.bf16.mxu1 %v6088_v58  ;;  %v6156_v58 = vld [vmem:[#allocation2 + $0x5f0] sm:$0xff]  }
  0x8a   :  { %5492 = vmatpush3.bf16.msra.mxu0 %v6087_v57  ;;  %v6155_v57 = vld [vmem:[#allocation2 + $0x530] sm:$0xff]  }
  0x8b   :  { %5493 = vmatprep.subr.bf16.mxu0 %v6090_v60  ;;  %v6158_v60 = vld [vmem:[#allocation2 + $0x568] sm:$0xff]  }
  0x8c   :  { %5514 = vmatpush3.bf16.msra.mxu1 %v6089_v59  ;;  %v6157_v59 = vld [vmem:[#allocation2 + $0x5b0] sm:$0xff]  }
  0x8d   :  { %5515 = vmatprep.subr.bf16.mxu1 %v6092_v62  ;;  %v6160_v62 = vld [vmem:[#allocation2 + $0x5e8] sm:$0xff]  }
  0x8e   :  { %5494 = vmatpush3.bf16.msra.mxu0 %v6091_v61  ;;  %v6159_v61 = vld [vmem:[#allocation2 + $0x528] sm:$0xff]  }
  0x8f   :  { %5495 = vmatprep.subr.bf16.mxu0 %v6094_v0  ;;  %v6162_v0 = vld [vmem:[#allocation2 + $0x560] sm:$0xff]  }
  0x90   :  { %5516 = vmatpush3.bf16.msra.mxu1 %v6093_v63  ;;  %v6161_v63 = vld [vmem:[#allocation2 + $0x5a8] sm:$0xff]  }
  0x91   :  { %5517 = vmatprep.subr.bf16.mxu1 %v6096_v2  ;;  %v6164_v2 = vld [vmem:[#allocation2 + $0x5e0] sm:$0xff]  }
  0x92   :  { %5496 = vmatpush3.bf16.msra.mxu0 %v6095_v1  ;;  %v6163_v1 = vld [vmem:[#allocation2 + $0x520] sm:$0xff]  }
  0x93   :  { %5497 = vmatprep.subr.bf16.mxu0 %v6098_v4  ;;  %v6166_v4 = vld [vmem:[#allocation2 + $0x558] sm:$0xff]  }
  0x94   :  { %5518 = vmatpush3.bf16.msra.mxu1 %v6097_v3  ;;  %v6165_v3 = vld [vmem:[#allocation2 + $0x5a0] sm:$0xff]  }
  0x95   :  { %5519 = vmatprep.subr.bf16.mxu1 %v6100_v6  ;;  %v6168_v6 = vld [vmem:[#allocation2 + $0x5d8] sm:$0xff]  }
  0x96   :  { %5498 = vmatpush3.bf16.msra.mxu0 %v6099_v5  ;;  %v6167_v5 = vld [vmem:[#allocation2 + $0x518] sm:$0xff]  }
  0x97   :  { %5499 = vmatprep.subr.bf16.mxu0 %v6102_v8  ;;  %v6170_v8 = vld [vmem:[#allocation2 + $0x550] sm:$0xff]  }
  0x98   :  { %5520 = vmatpush3.bf16.msra.mxu1 %v6101_v7  ;;  %v6169_v7 = vld [vmem:[#allocation2 + $0x598] sm:$0xff]  }
  0x99   :  { %5521 = vmatprep.subr.bf16.mxu1 %v6104_v10  ;;  %v6172_v10 = vld [vmem:[#allocation2 + $0x5d0] sm:$0xff]  }
  0x9a   :  { %5500 = vmatpush3.bf16.msra.mxu0 %v6103_v9  ;;  %v6171_v9 = vld [vmem:[#allocation2 + $0x510] sm:$0xff]  }
  0x9b   :  { %5529 = vmatprep.subr.bf16.mxu0 %v6109_v14  ;;  %v6176_v14 = vld [vmem:[#allocation2 + $0x5c8] sm:$0xff]  }
  0x9c   :  { %5522 = vmatpush3.bf16.msra.mxu1 %v6108_v13  ;;  %v6175_v13 = vld [vmem:[#allocation2 + $0x508] sm:$0xff]  }
  0x9d   :  { %4039 = vmatmul.mubr.bf16.vlgmr.msra.gmra.mxu0 %v6105_v11  ;;  %5551 = vmatprep.subr.bf16.mxu1 %v6114_v18  ;;  %v6173_v11 = vld [vmem:[#allocation2 + $0x590] sm:$0xff]   ;;  %v6180_v18 = vld [vmem:[#allocation2 + $0x5c0] sm:$0xff]  }
  0x9e   :  { %5530 = vmatpush3.bf16.msra.mxu0 %v6113_v17  ;;  %4120 = vmatprep.mubr.bf16.mxu0 %v6145_v48  ;;  %v6179_v17 = vld [vmem:[#allocation2 + $0x500] sm:$0xff]   ;;  %v6212_v48 = vld [vmem:[#allocation2 + $0x648] sm:$0xff]  }
  0x9f   :  { %4080 = vmatmul.mubr.bf16.vlgmr.msra.gmra.mxu1 %v6110_v15  ;;  %5531 = vmatprep.subr.bf16.mxu0 %v6116_v20  ;;  %v6177_v15 = vld [vmem:[#allocation2 + $0x588] sm:$0xff]  }
  0xa0   :  { %5552 = vmatpush3.bf16.msra.mxu1 %v6115_v19  ;;  %4161 = vmatprep.mubr.bf16.mxu1 %v6150_v52  ;;  %v6181_v19 = vld [vmem:[%s6908_s0 + $0x50] ss:$212 sps:$4 sm:$0xff]   ;;  %v6183_v20 = vld [vmem:[%s6908_s0 + $0x54] ss:$212 sps:$4 sm:$0xff]  }
  0xa1   :  { %5553 = vmatprep.subr.bf16.mxu1 %v6118_v22  ;;  %v6185_v22 = vld [vmem:[#allocation2 + $0x678] sm:$0xff]   ;;  %v6216_v52 = vld [vmem:[#allocation2 + $0x640] sm:$0xff]  }
  0xa2   :  { %5532 = vmatpush3.bf16.msra.mxu0 %v6117_v21  ;;  %v6184_v21 = vld [vmem:[#allocation2 + $0x580] sm:$0xff]  }
  0xa3   :  { %5533 = vmatprep.subr.bf16.mxu0 %v6120_v24  ;;  %v6188_v24 = vld [vmem:[%s6908_s0 + $0x5c] ss:$212 sps:$4 sm:$0xff]  }
  0xa4   :  { %5554 = vmatpush3.bf16.msra.mxu1 %v6119_v23  ;;  %v6186_v23 = vld [vmem:[%s6908_s0 + $0x58] ss:$212 sps:$4 sm:$0xff]  }
  0xa5   :  { %5555 = vmatprep.subr.bf16.mxu1 %v6122_v26  ;;  %v6190_v26 = vld [vmem:[#allocation2 + $0x6f8] sm:$0xff]  }
  0xa6   :  { %5534 = vmatpush3.bf16.msra.mxu0 %v6121_v25  ;;  %v6189_v25 = vld [vmem:[#allocation2 + $0x638] sm:$0xff]  }
  0xa7   :  { %5535 = vmatprep.subr.bf16.mxu0 %v6124_v28  ;;  %v6192_v28 = vld [vmem:[#allocation2 + $0x670] sm:$0xff]  }
  0xa8   :  { %5556 = vmatpush3.bf16.msra.mxu1 %v6123_v27  ;;  %v6191_v27 = vld [vmem:[#allocation2 + $0x6b8] sm:$0xff]  }
  0xa9   :  { %5557 = vmatprep.subr.bf16.mxu1 %v6126_v30  ;;  %v6194_v30 = vld [vmem:[#allocation2 + $0x6f0] sm:$0xff]  }
  0xaa   :  { %5536 = vmatpush3.bf16.msra.mxu0 %v6125_v29  ;;  %v6193_v29 = vld [vmem:[#allocation2 + $0x630] sm:$0xff]  }
  0xab   :  { %5537 = vmatprep.subr.bf16.mxu0 %v6128_v32  ;;  %v6196_v32 = vld [vmem:[#allocation2 + $0x668] sm:$0xff]  }
  0xac   :  { %5558 = vmatpush3.bf16.msra.mxu1 %v6127_v31  ;;  %v6195_v31 = vld [vmem:[#allocation2 + $0x6b0] sm:$0xff]  }
  0xad   :  { %5559 = vmatprep.subr.bf16.mxu1 %v6130_v34  ;;  %v6198_v34 = vld [vmem:[#allocation2 + $0x6e8] sm:$0xff]  }
  0xae   :  { %5538 = vmatpush3.bf16.msra.mxu0 %v6129_v33  ;;  %v6197_v33 = vld [vmem:[#allocation2 + $0x628] sm:$0xff]  }
  0xaf   :  { %5539 = vmatprep.subr.bf16.mxu0 %v6132_v36  ;;  %v6200_v36 = vld [vmem:[#allocation2 + $0x660] sm:$0xff]  }
  0xb0   :  { %5560 = vmatpush3.bf16.msra.mxu1 %v6131_v35  ;;  %v6199_v35 = vld [vmem:[#allocation2 + $0x6a8] sm:$0xff]  }
  0xb1   :  { %5561 = vmatprep.subr.bf16.mxu1 %v6134_v38  ;;  %v6202_v38 = vld [vmem:[#allocation2 + $0x6e0] sm:$0xff]  }
  0xb2   :  { %5540 = vmatpush3.bf16.msra.mxu0 %v6133_v37  ;;  %v6201_v37 = vld [vmem:[#allocation2 + $0x620] sm:$0xff]  }
  0xb3   :  { %5541 = vmatprep.subr.bf16.mxu0 %v6136_v40  ;;  %v6204_v40 = vld [vmem:[#allocation2 + $0x658] sm:$0xff]  }
  0xb4   :  { %5562 = vmatpush3.bf16.msra.mxu1 %v6135_v39  ;;  %v6203_v39 = vld [vmem:[#allocation2 + $0x6a0] sm:$0xff]  }
  0xb5   :  { %5563 = vmatprep.subr.bf16.mxu1 %v6138_v42  ;;  %v6206_v42 = vld [vmem:[#allocation2 + $0x6d8] sm:$0xff]  }
  0xb6   :  { %5542 = vmatpush3.bf16.msra.mxu0 %v6137_v41  ;;  %v6205_v41 = vld [vmem:[#allocation2 + $0x618] sm:$0xff]  }
  0xb7   :  { %5543 = vmatprep.subr.bf16.mxu0 %v6140_v44  ;;  %v6208_v44 = vld [vmem:[#allocation2 + $0x650] sm:$0xff]  }
  0xb8   :  { %5564 = vmatpush3.bf16.msra.mxu1 %v6139_v43  ;;  %v6207_v43 = vld [vmem:[#allocation2 + $0x698] sm:$0xff]  }
  0xb9   :  { %5565 = vmatprep.subr.bf16.mxu1 %v6142_v46  ;;  %v6210_v46 = vld [vmem:[#allocation2 + $0x6d0] sm:$0xff]  }
  0xba   :  { %5544 = vmatpush3.bf16.msra.mxu0 %v6141_v45  ;;  %v6209_v45 = vld [vmem:[#allocation2 + $0x610] sm:$0xff]  }
  0xbb   :  { %5573 = vmatprep.subr.bf16.mxu0 %v6147_v50  ;;  %v6214_v50 = vld [vmem:[#allocation2 + $0x6c8] sm:$0xff]  }
  0xbc   :  { %5566 = vmatpush3.bf16.msra.mxu1 %v6146_v49  ;;  %v6213_v49 = vld [vmem:[#allocation2 + $0x608] sm:$0xff]  }
  0xbd   :  { %4121 = vmatmul.mubr.bf16.vlgmr.msra.gmra.mxu0 %v6143_v47  ;;  %5595 = vmatprep.subr.bf16.mxu1 %v6152_v54  ;;  %v6211_v47 = vld [vmem:[#allocation2 + $0x690] sm:$0xff]   ;;  %v6218_v54 = vld [vmem:[#allocation2 + $0x6c0] sm:$0xff]  }
  0xbe   :  { %5574 = vmatpush3.bf16.msra.mxu0 %v6151_v53  ;;  %4202 = vmatprep.mubr.bf16.mxu0 %v6183_v20  ;;  %v6217_v53 = vld [vmem:[#allocation2 + $0x600] sm:$0xff]   ;;  %v6250_v20 = vld [vmem:[#allocation2 + $0x748] sm:$0xff]  }
  0xbf   :  { %4162 = vmatmul.mubr.bf16.vlgmr.msra.gmra.mxu1 %v6148_v51  ;;  %5575 = vmatprep.subr.bf16.mxu0 %v6154_v56  ;;  %v6215_v51 = vld [vmem:[#allocation2 + $0x688] sm:$0xff]   ;;  %v6221_v56 = vld [vmem:[%s6908_s0 + $0x64] ss:$212 sps:$4 sm:$0xff]  }
  0xc0   :  { %5596 = vmatpush3.bf16.msra.mxu1 %v6153_v55  ;;  %4243 = vmatprep.mubr.bf16.mxu1 %v6188_v24  ;;  %v6219_v55 = vld [vmem:[%s6908_s0 + $0x60] ss:$212 sps:$4 sm:$0xff]  }
  0xc1   :  { %5597 = vmatprep.subr.bf16.mxu1 %v6156_v58  ;;  %v6223_v58 = vld [vmem:[#allocation2 + $0x778] sm:$0xff]   ;;  %v6254_v24 = vld [vmem:[#allocation2 + $0x740] sm:$0xff]  }
  0xc2   :  { %5576 = vmatpush3.bf16.msra.mxu0 %v6155_v57  ;;  %v6222_v57 = vld [vmem:[#allocation2 + $0x680] sm:$0xff]  }
  0xc3   :  { %5577 = vmatprep.subr.bf16.mxu0 %v6158_v60  ;;  %v6226_v60 = vld [vmem:[%s6908_s0 + $0x6c] ss:$212 sps:$4 sm:$0xff]  }
  0xc4   :  { %5598 = vmatpush3.bf16.msra.mxu1 %v6157_v59  ;;  %v6224_v59 = vld [vmem:[%s6908_s0 + $0x68] ss:$212 sps:$4 sm:$0xff]  }
  0xc5   :  { %5599 = vmatprep.subr.bf16.mxu1 %v6160_v62  ;;  %v6228_v62 = vld [vmem:[#allocation2 + $0x7f8] sm:$0xff]  }
  0xc6   :  { %5578 = vmatpush3.bf16.msra.mxu0 %v6159_v61  ;;  %v6227_v61 = vld [vmem:[#allocation2 + $0x738] sm:$0xff]  }
  0xc7   :  { %5579 = vmatprep.subr.bf16.mxu0 %v6162_v0  ;;  %v6230_v0 = vld [vmem:[#allocation2 + $0x770] sm:$0xff]  }
  0xc8   :  { %5600 = vmatpush3.bf16.msra.mxu1 %v6161_v63  ;;  %v6229_v63 = vld [vmem:[#allocation2 + $0x7b8] sm:$0xff]  }
  0xc9   :  { %5601 = vmatprep.subr.bf16.mxu1 %v6164_v2  ;;  %v6232_v2 = vld [vmem:[#allocation2 + $0x7f0] sm:$0xff]  }
  0xca   :  { %5580 = vmatpush3.bf16.msra.mxu0 %v6163_v1  ;;  %v6231_v1 = vld [vmem:[#allocation2 + $0x730] sm:$0xff]  }
  0xcb   :  { %5581 = vmatprep.subr.bf16.mxu0 %v6166_v4  ;;  %v6234_v4 = vld [vmem:[#allocation2 + $0x768] sm:$0xff]  }
  0xcc   :  { %5602 = vmatpush3.bf16.msra.mxu1 %v6165_v3  ;;  %v6233_v3 = vld [vmem:[#allocation2 + $0x7b0] sm:$0xff]  }
  0xcd   :  { %5603 = vmatprep.subr.bf16.mxu1 %v6168_v6  ;;  %v6236_v6 = vld [vmem:[#allocation2 + $0x7e8] sm:$0xff]  }
  0xce   :  { %5582 = vmatpush3.bf16.msra.mxu0 %v6167_v5  ;;  %v6235_v5 = vld [vmem:[#allocation2 + $0x728] sm:$0xff]  }
  0xcf   :  { %5583 = vmatprep.subr.bf16.mxu0 %v6170_v8  ;;  %v6238_v8 = vld [vmem:[#allocation2 + $0x760] sm:$0xff]  }
  0xd0   :  { %5604 = vmatpush3.bf16.msra.mxu1 %v6169_v7  ;;  %v6237_v7 = vld [vmem:[#allocation2 + $0x7a8] sm:$0xff]  }
  0xd1   :  { %5605 = vmatprep.subr.bf16.mxu1 %v6172_v10  ;;  %v6240_v10 = vld [vmem:[#allocation2 + $0x7e0] sm:$0xff]  }
  0xd2   :  { %5584 = vmatpush3.bf16.msra.mxu0 %v6171_v9  ;;  %v6239_v9 = vld [vmem:[#allocation2 + $0x720] sm:$0xff]  }
  0xd3   :  { %5585 = vmatprep.subr.bf16.mxu0 %v6174_v12  ;;  %v6242_v12 = vld [vmem:[#allocation2 + $0x758] sm:$0xff]  }
  0xd4   :  { %5606 = vmatpush3.bf16.msra.mxu1 %v6173_v11  ;;  %v6241_v11 = vld [vmem:[#allocation2 + $0x7a0] sm:$0xff]  }
  0xd5   :  { %5607 = vmatprep.subr.bf16.mxu1 %v6176_v14  ;;  %v6244_v14 = vld [vmem:[#allocation2 + $0x7d8] sm:$0xff]  }
  0xd6   :  { %5586 = vmatpush3.bf16.msra.mxu0 %v6175_v13  ;;  %v6243_v13 = vld [vmem:[#allocation2 + $0x718] sm:$0xff]  }
  0xd7   :  { %5587 = vmatprep.subr.bf16.mxu0 %v6178_v16  ;;  %v6246_v16 = vld [vmem:[#allocation2 + $0x750] sm:$0xff]  }
  0xd8   :  { %5608 = vmatpush3.bf16.msra.mxu1 %v6177_v15  ;;  %v6245_v15 = vld [vmem:[#allocation2 + $0x798] sm:$0xff]  }
  0xd9   :  { %5609 = vmatprep.subr.bf16.mxu1 %v6180_v18  ;;  %v6248_v18 = vld [vmem:[#allocation2 + $0x7d0] sm:$0xff]  }
  0xda   :  { %5588 = vmatpush3.bf16.msra.mxu0 %v6179_v17  ;;  %v6247_v17 = vld [vmem:[#allocation2 + $0x710] sm:$0xff]  }
  0xdb   :  { %5617 = vmatprep.subr.bf16.mxu0 %v6185_v22  ;;  %v6252_v22 = vld [vmem:[#allocation2 + $0x7c8] sm:$0xff]  }
  0xdc   :  { %5610 = vmatpush3.bf16.msra.mxu1 %v6184_v21  ;;  %v6251_v21 = vld [vmem:[#allocation2 + $0x708] sm:$0xff]  }
  0xdd   :  { %4203 = vmatmul.mubr.bf16.vlgmr.msra.gmra.mxu0 %v6181_v19  ;;  %5639 = vmatprep.subr.bf16.mxu1 %v6190_v26  ;;  %v6249_v19 = vld [vmem:[#allocation2 + $0x790] sm:$0xff]   ;;  %v6256_v26 = vld [vmem:[#allocation2 + $0x7c0] sm:$0xff]  }
  0xde   :  { %5618 = vmatpush3.bf16.msra.mxu0 %v6189_v25  ;;  %4284 = vmatprep.mubr.bf16.mxu0 %v6221_v56  ;;  %v6255_v25 = vld [vmem:[#allocation2 + $0x700] sm:$0xff]   ;;  %v6288_v56 = vld [vmem:[#allocation2 + $0x848] sm:$0xff]  }
  0xdf   :  { %4244 = vmatmul.mubr.bf16.vlgmr.msra.gmra.mxu1 %v6186_v23  ;;  %5619 = vmatprep.subr.bf16.mxu0 %v6192_v28  ;;  %v6253_v23 = vld [vmem:[#allocation2 + $0x788] sm:$0xff]  }
  0xe0   :  { %5640 = vmatpush3.bf16.msra.mxu1 %v6191_v27  ;;  %4325 = vmatprep.mubr.bf16.mxu1 %v6226_v60  ;;  %v6257_v27 = vld [vmem:[%s6908_s0 + $0x70] ss:$212 sps:$4 sm:$0xff]   ;;  %v6259_v28 = vld [vmem:[%s6908_s0 + $0x74] ss:$212 sps:$4 sm:$0xff]  }
  0xe1   :  { %5641 = vmatprep.subr.bf16.mxu1 %v6194_v30  ;;  %v6261_v30 = vld [vmem:[#allocation2 + $0x878] sm:$0xff]   ;;  %v6292_v60 = vld [vmem:[#allocation2 + $0x840] sm:$0xff]  }
  0xe2   :  { %5620 = vmatpush3.bf16.msra.mxu0 %v6193_v29  ;;  %v6260_v29 = vld [vmem:[#allocation2 + $0x780] sm:$0xff]  }
  0xe3   :  { %5621 = vmatprep.subr.bf16.mxu0 %v6196_v32  ;;  %v6264_v32 = vld [vmem:[%s6908_s0 + $0x7c] ss:$212 sps:$4 sm:$0xff]  }
  0xe4   :  { %5642 = vmatpush3.bf16.msra.mxu1 %v6195_v31  ;;  %v6262_v31 = vld [vmem:[%s6908_s0 + $0x78] ss:$212 sps:$4 sm:$0xff]  }
  0xe5   :  { %5643 = vmatprep.subr.bf16.mxu1 %v6198_v34  ;;  %v6266_v34 = vld [vmem:[#allocation2 + $0x8f8] sm:$0xff]  }
  0xe6   :  { %5622 = vmatpush3.bf16.msra.mxu0 %v6197_v33  ;;  %v6265_v33 = vld [vmem:[#allocation2 + $0x838] sm:$0xff]  }
  0xe7   :  { %5623 = vmatprep.subr.bf16.mxu0 %v6200_v36  ;;  %v6268_v36 = vld [vmem:[#allocation2 + $0x870] sm:$0xff]  }
  0xe8   :  { %5644 = vmatpush3.bf16.msra.mxu1 %v6199_v35  ;;  %v6267_v35 = vld [vmem:[#allocation2 + $0x8b8] sm:$0xff]  }
  0xe9   :  { %5645 = vmatprep.subr.bf16.mxu1 %v6202_v38  ;;  %v6270_v38 = vld [vmem:[#allocation2 + $0x8f0] sm:$0xff]  }
  0xea   :  { %5624 = vmatpush3.bf16.msra.mxu0 %v6201_v37  ;;  %v6269_v37 = vld [vmem:[#allocation2 + $0x830] sm:$0xff]  }
  0xeb   :  { %5625 = vmatprep.subr.bf16.mxu0 %v6204_v40  ;;  %v6272_v40 = vld [vmem:[#allocation2 + $0x868] sm:$0xff]  }
  0xec   :  { %5646 = vmatpush3.bf16.msra.mxu1 %v6203_v39  ;;  %v6271_v39 = vld [vmem:[#allocation2 + $0x8b0] sm:$0xff]  }
  0xed   :  { %5647 = vmatprep.subr.bf16.mxu1 %v6206_v42  ;;  %v6274_v42 = vld [vmem:[#allocation2 + $0x8e8] sm:$0xff]  }
  0xee   :  { %5626 = vmatpush3.bf16.msra.mxu0 %v6205_v41  ;;  %v6273_v41 = vld [vmem:[#allocation2 + $0x828] sm:$0xff]  }
  0xef   :  { %5627 = vmatprep.subr.bf16.mxu0 %v6208_v44  ;;  %v6276_v44 = vld [vmem:[#allocation2 + $0x860] sm:$0xff]  }
  0xf0   :  { %5648 = vmatpush3.bf16.msra.mxu1 %v6207_v43  ;;  %v6275_v43 = vld [vmem:[#allocation2 + $0x8a8] sm:$0xff]  }
  0xf1   :  { %5649 = vmatprep.subr.bf16.mxu1 %v6210_v46  ;;  %v6278_v46 = vld [vmem:[#allocation2 + $0x8e0] sm:$0xff]  }
  0xf2   :  { %5628 = vmatpush3.bf16.msra.mxu0 %v6209_v45  ;;  %v6277_v45 = vld [vmem:[#allocation2 + $0x820] sm:$0xff]  }
  0xf3   :  { %5629 = vmatprep.subr.bf16.mxu0 %v6212_v48  ;;  %v6280_v48 = vld [vmem:[#allocation2 + $0x858] sm:$0xff]  }
  0xf4   :  { %5650 = vmatpush3.bf16.msra.mxu1 %v6211_v47  ;;  %v6279_v47 = vld [vmem:[#allocation2 + $0x8a0] sm:$0xff]  }
  0xf5   :  { %5651 = vmatprep.subr.bf16.mxu1 %v6214_v50  ;;  %v6282_v50 = vld [vmem:[#allocation2 + $0x8d8] sm:$0xff]  }
  0xf6   :  { %5630 = vmatpush3.bf16.msra.mxu0 %v6213_v49  ;;  %v6281_v49 = vld [vmem:[#allocation2 + $0x818] sm:$0xff]  }
  0xf7   :  { %5631 = vmatprep.subr.bf16.mxu0 %v6216_v52  ;;  %v6284_v52 = vld [vmem:[#allocation2 + $0x850] sm:$0xff]  }
  0xf8   :  { %5652 = vmatpush3.bf16.msra.mxu1 %v6215_v51  ;;  %v6283_v51 = vld [vmem:[#allocation2 + $0x898] sm:$0xff]  }
  0xf9   :  { %5653 = vmatprep.subr.bf16.mxu1 %v6218_v54  ;;  %v6286_v54 = vld [vmem:[#allocation2 + $0x8d0] sm:$0xff]  }
  0xfa   :  { %5632 = vmatpush3.bf16.msra.mxu0 %v6217_v53  ;;  %v6285_v53 = vld [vmem:[#allocation2 + $0x810] sm:$0xff]  }
  0xfb   :  { %5661 = vmatprep.subr.bf16.mxu0 %v6223_v58  ;;  %v6290_v58 = vld [vmem:[#allocation2 + $0x8c8] sm:$0xff]  }
  0xfc   :  { %5654 = vmatpush3.bf16.msra.mxu1 %v6222_v57  ;;  %v6289_v57 = vld [vmem:[#allocation2 + $0x808] sm:$0xff]  }
  0xfd   :  { %4285 = vmatmul.mubr.bf16.vlgmr.msra.gmra.mxu0 %v6219_v55  ;;  %5683 = vmatprep.subr.bf16.mxu1 %v6228_v62  ;;  %v6287_v55 = vld [vmem:[#allocation2 + $0x890] sm:$0xff]   ;;  %v6294_v62 = vld [vmem:[#allocation2 + $0x8c0] sm:$0xff]  }
  0xfe   :  { %5662 = vmatpush3.bf16.msra.mxu0 %v6227_v61  ;;  %4366 = vmatprep.mubr.bf16.mxu0 %v6259_v28  ;;  %v6293_v61 = vld [vmem:[#allocation2 + $0x800] sm:$0xff]   ;;  %v6326_v28 = vld [vmem:[#allocation2 + $0x948] sm:$0xff]  }
  0xff   :  { %4326 = vmatmul.mubr.bf16.vlgmr.msra.gmra.mxu1 %v6224_v59  ;;  %5663 = vmatprep.subr.bf16.mxu0 %v6230_v0  ;;  %v6291_v59 = vld [vmem:[#allocation2 + $0x888] sm:$0xff]   ;;  %v6297_v0 = vld [vmem:[%s6908_s0 + $0x84] ss:$212 sps:$4 sm:$0xff]  }
 0x100   :  { %5684 = vmatpush3.bf16.msra.mxu1 %v6229_v63  ;;  %4407 = vmatprep.mubr.bf16.mxu1 %v6264_v32  ;;  %v6295_v63 = vld [vmem:[%s6908_s0 + $0x80] ss:$212 sps:$4 sm:$0xff]  }
 0x101   :  { %5685 = vmatprep.subr.bf16.mxu1 %v6232_v2  ;;  %v6299_v2 = vld [vmem:[#allocation2 + $0x978] sm:$0xff]   ;;  %v6330_v32 = vld [vmem:[#allocation2 + $0x940] sm:$0xff]  }
 0x102   :  { %5664 = vmatpush3.bf16.msra.mxu0 %v6231_v1  ;;  %v6298_v1 = vld [vmem:[#allocation2 + $0x880] sm:$0xff]  }
 0x103   :  { %5665 = vmatprep.subr.bf16.mxu0 %v6234_v4  ;;  %v6302_v4 = vld [vmem:[%s6908_s0 + $0x8c] ss:$212 sps:$4 sm:$0xff]  }
 0x104   :  { %5686 = vmatpush3.bf16.msra.mxu1 %v6233_v3  ;;  %v6300_v3 = vld [vmem:[%s6908_s0 + $0x88] ss:$212 sps:$4 sm:$0xff]  }
 0x105   :  { %5687 = vmatprep.subr.bf16.mxu1 %v6236_v6  ;;  %v6304_v6 = vld [vmem:[#allocation2 + $0x9f8] sm:$0xff]  }
 0x106   :  { %5666 = vmatpush3.bf16.msra.mxu0 %v6235_v5  ;;  %v6303_v5 = vld [vmem:[#allocation2 + $0x938] sm:$0xff]  }
 0x107   :  { %5667 = vmatprep.subr.bf16.mxu0 %v6238_v8  ;;  %v6306_v8 = vld [vmem:[#allocation2 + $0x970] sm:$0xff]  }
 0x108   :  { %5688 = vmatpush3.bf16.msra.mxu1 %v6237_v7  ;;  %v6305_v7 = vld [vmem:[#allocation2 + $0x9b8] sm:$0xff]  }
 0x109   :  { %5689 = vmatprep.subr.bf16.mxu1 %v6240_v10  ;;  %v6308_v10 = vld [vmem:[#allocation2 + $0x9f0] sm:$0xff]  }
 0x10a   :  { %5668 = vmatpush3.bf16.msra.mxu0 %v6239_v9  ;;  %v6307_v9 = vld [vmem:[#allocation2 + $0x930] sm:$0xff]  }
 0x10b   :  { %5669 = vmatprep.subr.bf16.mxu0 %v6242_v12  ;;  %v6310_v12 = vld [vmem:[#allocation2 + $0x968] sm:$0xff]  }
 0x10c   :  { %5690 = vmatpush3.bf16.msra.mxu1 %v6241_v11  ;;  %v6309_v11 = vld [vmem:[#allocation2 + $0x9b0] sm:$0xff]  }
 0x10d   :  { %5691 = vmatprep.subr.bf16.mxu1 %v6244_v14  ;;  %v6312_v14 = vld [vmem:[#allocation2 + $0x9e8] sm:$0xff]  }
 0x10e   :  { %5670 = vmatpush3.bf16.msra.mxu0 %v6243_v13  ;;  %v6311_v13 = vld [vmem:[#allocation2 + $0x928] sm:$0xff]  }
 0x10f   :  { %5671 = vmatprep.subr.bf16.mxu0 %v6246_v16  ;;  %v6314_v16 = vld [vmem:[#allocation2 + $0x960] sm:$0xff]  }
 0x110   :  { %5692 = vmatpush3.bf16.msra.mxu1 %v6245_v15  ;;  %v6313_v15 = vld [vmem:[#allocation2 + $0x9a8] sm:$0xff]  }
 0x111   :  { %5693 = vmatprep.subr.bf16.mxu1 %v6248_v18  ;;  %v6316_v18 = vld [vmem:[#allocation2 + $0x9e0] sm:$0xff]  }
 0x112   :  { %5672 = vmatpush3.bf16.msra.mxu0 %v6247_v17  ;;  %v6315_v17 = vld [vmem:[#allocation2 + $0x920] sm:$0xff]  }
 0x113   :  { %5673 = vmatprep.subr.bf16.mxu0 %v6250_v20  ;;  %v6318_v20 = vld [vmem:[#allocation2 + $0x958] sm:$0xff]  }
 0x114   :  { %5694 = vmatpush3.bf16.msra.mxu1 %v6249_v19  ;;  %v6317_v19 = vld [vmem:[#allocation2 + $0x9a0] sm:$0xff]  }
 0x115   :  { %5695 = vmatprep.subr.bf16.mxu1 %v6252_v22  ;;  %v6320_v22 = vld [vmem:[#allocation2 + $0x9d8] sm:$0xff]  }
 0x116   :  { %5674 = vmatpush3.bf16.msra.mxu0 %v6251_v21  ;;  %v6319_v21 = vld [vmem:[#allocation2 + $0x918] sm:$0xff]  }
 0x117   :  { %5675 = vmatprep.subr.bf16.mxu0 %v6254_v24  ;;  %v6322_v24 = vld [vmem:[#allocation2 + $0x950] sm:$0xff]  }
 0x118   :  { %5696 = vmatpush3.bf16.msra.mxu1 %v6253_v23  ;;  %v6321_v23 = vld [vmem:[#allocation2 + $0x998] sm:$0xff]  }
 0x119   :  { %5697 = vmatprep.subr.bf16.mxu1 %v6256_v26  ;;  %v6324_v26 = vld [vmem:[#allocation2 + $0x9d0] sm:$0xff]  }
 0x11a   :  { %5676 = vmatpush3.bf16.msra.mxu0 %v6255_v25  ;;  %v6323_v25 = vld [vmem:[#allocation2 + $0x910] sm:$0xff]  }
 0x11b   :  { %5705 = vmatprep.subr.bf16.mxu0 %v6261_v30  ;;  %v6328_v30 = vld [vmem:[#allocation2 + $0x9c8] sm:$0xff]  }
 0x11c   :  { %5698 = vmatpush3.bf16.msra.mxu1 %v6260_v29  ;;  %v6327_v29 = vld [vmem:[#allocation2 + $0x908] sm:$0xff]  }
 0x11d   :  { %4367 = vmatmul.mubr.bf16.vlgmr.msra.gmra.mxu0 %v6257_v27  ;;  %5727 = vmatprep.subr.bf16.mxu1 %v6266_v34  ;;  %v6325_v27 = vld [vmem:[#allocation2 + $0x990] sm:$0xff]   ;;  %v6332_v34 = vld [vmem:[#allocation2 + $0x9c0] sm:$0xff]  }
 0x11e   :  { %5706 = vmatpush3.bf16.msra.mxu0 %v6265_v33  ;;  %4448 = vmatprep.mubr.bf16.mxu0 %v6297_v0  ;;  %v6331_v33 = vld [vmem:[#allocation2 + $0x900] sm:$0xff]   ;;  %v6364_v0 = vld [vmem:[#allocation2 + $0xa48] sm:$0xff]  }
 0x11f   :  { %4408 = vmatmul.mubr.bf16.vlgmr.msra.gmra.mxu1 %v6262_v31  ;;  %5707 = vmatprep.subr.bf16.mxu0 %v6268_v36  ;;  %v6329_v31 = vld [vmem:[#allocation2 + $0x988] sm:$0xff]  }
 0x120   :  { %5728 = vmatpush3.bf16.msra.mxu1 %v6267_v35  ;;  %4489 = vmatprep.mubr.bf16.mxu1 %v6302_v4  ;;  %v6333_v35 = vld [vmem:[%s6908_s0 + $0x90] ss:$212 sps:$4 sm:$0xff]   ;;  %v6335_v36 = vld [vmem:[%s6908_s0 + $0x94] ss:$212 sps:$4 sm:$0xff]  }
 0x121   :  { %5729 = vmatprep.subr.bf16.mxu1 %v6270_v38  ;;  %v6337_v38 = vld [vmem:[#allocation2 + $0xa78] sm:$0xff]   ;;  %v6368_v4 = vld [vmem:[#allocation2 + $0xa40] sm:$0xff]  }
 0x122   :  { %5708 = vmatpush3.bf16.msra.mxu0 %v6269_v37  ;;  %v6336_v37 = vld [vmem:[#allocation2 + $0x980] sm:$0xff]  }
 0x123   :  { %5709 = vmatprep.subr.bf16.mxu0 %v6272_v40  ;;  %v6340_v40 = vld [vmem:[%s6908_s0 + $0x9c] ss:$212 sps:$4 sm:$0xff]  }
 0x124   :  { %5730 = vmatpush3.bf16.msra.mxu1 %v6271_v39  ;;  %v6338_v39 = vld [vmem:[%s6908_s0 + $0x98] ss:$212 sps:$4 sm:$0xff]  }
 0x125   :  { %5731 = vmatprep.subr.bf16.mxu1 %v6274_v42  ;;  %v6342_v42 = vld [vmem:[#allocation2 + $0xaf8] sm:$0xff]  }
 0x126   :  { %5710 = vmatpush3.bf16.msra.mxu0 %v6273_v41  ;;  %v6341_v41 = vld [vmem:[#allocation2 + $0xa38] sm:$0xff]  }
 0x127   :  { %5711 = vmatprep.subr.bf16.mxu0 %v6276_v44  ;;  %v6344_v44 = vld [vmem:[#allocation2 + $0xa70] sm:$0xff]  }
 0x128   :  { %5732 = vmatpush3.bf16.msra.mxu1 %v6275_v43  ;;  %v6343_v43 = vld [vmem:[#allocation2 + $0xab8] sm:$0xff]  }
 0x129   :  { %5733 = vmatprep.subr.bf16.mxu1 %v6278_v46  ;;  %v6346_v46 = vld [vmem:[#allocation2 + $0xaf0] sm:$0xff]  }
 0x12a   :  { %5712 = vmatpush3.bf16.msra.mxu0 %v6277_v45  ;;  %v6345_v45 = vld [vmem:[#allocation2 + $0xa30] sm:$0xff]  }
 0x12b   :  { %5713 = vmatprep.subr.bf16.mxu0 %v6280_v48  ;;  %v6348_v48 = vld [vmem:[#allocation2 + $0xa68] sm:$0xff]  }
 0x12c   :  { %5734 = vmatpush3.bf16.msra.mxu1 %v6279_v47  ;;  %v6347_v47 = vld [vmem:[#allocation2 + $0xab0] sm:$0xff]  }
 0x12d   :  { %5735 = vmatprep.subr.bf16.mxu1 %v6282_v50  ;;  %v6350_v50 = vld [vmem:[#allocation2 + $0xae8] sm:$0xff]  }
 0x12e   :  { %5714 = vmatpush3.bf16.msra.mxu0 %v6281_v49  ;;  %v6349_v49 = vld [vmem:[#allocation2 + $0xa28] sm:$0xff]  }
 0x12f   :  { %5715 = vmatprep.subr.bf16.mxu0 %v6284_v52  ;;  %v6352_v52 = vld [vmem:[#allocation2 + $0xa60] sm:$0xff]  }
 0x130   :  { %5736 = vmatpush3.bf16.msra.mxu1 %v6283_v51  ;;  %v6351_v51 = vld [vmem:[#allocation2 + $0xaa8] sm:$0xff]  }
 0x131   :  { %5737 = vmatprep.subr.bf16.mxu1 %v6286_v54  ;;  %v6354_v54 = vld [vmem:[#allocation2 + $0xae0] sm:$0xff]  }
 0x132   :  { %5716 = vmatpush3.bf16.msra.mxu0 %v6285_v53  ;;  %v6353_v53 = vld [vmem:[#allocation2 + $0xa20] sm:$0xff]  }
 0x133   :  { %5717 = vmatprep.subr.bf16.mxu0 %v6288_v56  ;;  %v6356_v56 = vld [vmem:[#allocation2 + $0xa58] sm:$0xff]  }
 0x134   :  { %5738 = vmatpush3.bf16.msra.mxu1 %v6287_v55  ;;  %v6355_v55 = vld [vmem:[#allocation2 + $0xaa0] sm:$0xff]  }
 0x135   :  { %5739 = vmatprep.subr.bf16.mxu1 %v6290_v58  ;;  %v6358_v58 = vld [vmem:[#allocation2 + $0xad8] sm:$0xff]  }
 0x136   :  { %5718 = vmatpush3.bf16.msra.mxu0 %v6289_v57  ;;  %v6357_v57 = vld [vmem:[#allocation2 + $0xa18] sm:$0xff]  }
 0x137   :  { %5719 = vmatprep.subr.bf16.mxu0 %v6292_v60  ;;  %v6360_v60 = vld [vmem:[#allocation2 + $0xa50] sm:$0xff]  }
 0x138   :  { %5740 = vmatpush3.bf16.msra.mxu1 %v6291_v59  ;;  %v6359_v59 = vld [vmem:[#allocation2 + $0xa98] sm:$0xff]  }
 0x139   :  { %5741 = vmatprep.subr.bf16.mxu1 %v6294_v62  ;;  %v6362_v62 = vld [vmem:[#allocation2 + $0xad0] sm:$0xff]  }
 0x13a   :  { %5720 = vmatpush3.bf16.msra.mxu0 %v6293_v61  ;;  %v6361_v61 = vld [vmem:[#allocation2 + $0xa10] sm:$0xff]  }
 0x13b   :  { %5749 = vmatprep.subr.bf16.mxu0 %v6299_v2  ;;  %v6366_v2 = vld [vmem:[#allocation2 + $0xac8] sm:$0xff]  }
 0x13c   :  { %5742 = vmatpush3.bf16.msra.mxu1 %v6298_v1  ;;  %v6365_v1 = vld [vmem:[#allocation2 + $0xa08] sm:$0xff]  }
 0x13d   :  { %4449 = vmatmul.mubr.bf16.vlgmr.msra.gmra.mxu0 %v6295_v63  ;;  %5771 = vmatprep.subr.bf16.mxu1 %v6304_v6  ;;  %v6363_v63 = vld [vmem:[#allocation2 + $0xa90] sm:$0xff]   ;;  %v6370_v6 = vld [vmem:[#allocation2 + $0xac0] sm:$0xff]  }
 0x13e   :  { %5750 = vmatpush3.bf16.msra.mxu0 %v6303_v5  ;;  %4530 = vmatprep.mubr.bf16.mxu0 %v6335_v36  ;;  %v6369_v5 = vld [vmem:[#allocation2 + $0xa00] sm:$0xff]   ;;  %v6402_v36 = vld [vmem:[#allocation2 + $0xb48] sm:$0xff]  }
 0x13f   :  { %4490 = vmatmul.mubr.bf16.vlgmr.msra.gmra.mxu1 %v6300_v3  ;;  %5751 = vmatprep.subr.bf16.mxu0 %v6306_v8  ;;  %v6367_v3 = vld [vmem:[#allocation2 + $0xa88] sm:$0xff]   ;;  %v6373_v8 = vld [vmem:[%s6908_s0 + $0xa4] ss:$212 sps:$4 sm:$0xff]  }
 0x140   :  { %5772 = vmatpush3.bf16.msra.mxu1 %v6305_v7  ;;  %4571 = vmatprep.mubr.bf16.mxu1 %v6340_v40  ;;  %v6371_v7 = vld [vmem:[%s6908_s0 + $0xa0] ss:$212 sps:$4 sm:$0xff]  }
 0x141   :  { %5773 = vmatprep.subr.bf16.mxu1 %v6308_v10  ;;  %v6375_v10 = vld [vmem:[#allocation2 + $0xb78] sm:$0xff]   ;;  %v6406_v40 = vld [vmem:[#allocation2 + $0xb40] sm:$0xff]  }
 0x142   :  { %5752 = vmatpush3.bf16.msra.mxu0 %v6307_v9  ;;  %v6374_v9 = vld [vmem:[#allocation2 + $0xa80] sm:$0xff]  }
 0x143   :  { %5753 = vmatprep.subr.bf16.mxu0 %v6310_v12  ;;  %v6378_v12 = vld [vmem:[%s6908_s0 + $0xac] ss:$212 sps:$4 sm:$0xff]  }
 0x144   :  { %5774 = vmatpush3.bf16.msra.mxu1 %v6309_v11  ;;  %v6376_v11 = vld [vmem:[%s6908_s0 + $0xa8] ss:$212 sps:$4 sm:$0xff]  }
 0x145   :  { %5775 = vmatprep.subr.bf16.mxu1 %v6312_v14  ;;  %v6380_v14 = vld [vmem:[#allocation2 + $0xbf8] sm:$0xff]  }
 0x146   :  { %5754 = vmatpush3.bf16.msra.mxu0 %v6311_v13  ;;  %v6379_v13 = vld [vmem:[#allocation2 + $0xb38] sm:$0xff]  }
 0x147   :  { %5755 = vmatprep.subr.bf16.mxu0 %v6314_v16  ;;  %v6382_v16 = vld [vmem:[#allocation2 + $0xb70] sm:$0xff]  }
 0x148   :  { %5776 = vmatpush3.bf16.msra.mxu1 %v6313_v15  ;;  %v6381_v15 = vld [vmem:[#allocation2 + $0xbb8] sm:$0xff]  }
 0x149   :  { %5777 = vmatprep.subr.bf16.mxu1 %v6316_v18  ;;  %v6384_v18 = vld [vmem:[#allocation2 + $0xbf0] sm:$0xff]  }
 0x14a   :  { %5756 = vmatpush3.bf16.msra.mxu0 %v6315_v17  ;;  %v6383_v17 = vld [vmem:[#allocation2 + $0xb30] sm:$0xff]  }
 0x14b   :  { %5757 = vmatprep.subr.bf16.mxu0 %v6318_v20  ;;  %v6386_v20 = vld [vmem:[#allocation2 + $0xb68] sm:$0xff]  }
 0x14c   :  { %5778 = vmatpush3.bf16.msra.mxu1 %v6317_v19  ;;  %v6385_v19 = vld [vmem:[#allocation2 + $0xbb0] sm:$0xff]  }
 0x14d   :  { %5779 = vmatprep.subr.bf16.mxu1 %v6320_v22  ;;  %v6388_v22 = vld [vmem:[#allocation2 + $0xbe8] sm:$0xff]  }
 0x14e   :  { %5758 = vmatpush3.bf16.msra.mxu0 %v6319_v21  ;;  %v6387_v21 = vld [vmem:[#allocation2 + $0xb28] sm:$0xff]  }
 0x14f   :  { %5759 = vmatprep.subr.bf16.mxu0 %v6322_v24  ;;  %v6390_v24 = vld [vmem:[#allocation2 + $0xb60] sm:$0xff]  }
 0x150   :  { %5780 = vmatpush3.bf16.msra.mxu1 %v6321_v23  ;;  %v6389_v23 = vld [vmem:[#allocation2 + $0xba8] sm:$0xff]  }
 0x151   :  { %5781 = vmatprep.subr.bf16.mxu1 %v6324_v26  ;;  %v6392_v26 = vld [vmem:[#allocation2 + $0xbe0] sm:$0xff]  }
 0x152   :  { %5760 = vmatpush3.bf16.msra.mxu0 %v6323_v25  ;;  %v6391_v25 = vld [vmem:[#allocation2 + $0xb20] sm:$0xff]  }
 0x153   :  { %5761 = vmatprep.subr.bf16.mxu0 %v6326_v28  ;;  %v6394_v28 = vld [vmem:[#allocation2 + $0xb58] sm:$0xff]  }
 0x154   :  { %5782 = vmatpush3.bf16.msra.mxu1 %v6325_v27  ;;  %v6393_v27 = vld [vmem:[#allocation2 + $0xba0] sm:$0xff]  }
 0x155   :  { %5783 = vmatprep.subr.bf16.mxu1 %v6328_v30  ;;  %v6396_v30 = vld [vmem:[#allocation2 + $0xbd8] sm:$0xff]  }
 0x156   :  { %5762 = vmatpush3.bf16.msra.mxu0 %v6327_v29  ;;  %v6395_v29 = vld [vmem:[#allocation2 + $0xb18] sm:$0xff]  }
 0x157   :  { %5763 = vmatprep.subr.bf16.mxu0 %v6330_v32  ;;  %v6398_v32 = vld [vmem:[#allocation2 + $0xb50] sm:$0xff]  }
 0x158   :  { %5784 = vmatpush3.bf16.msra.mxu1 %v6329_v31  ;;  %v6397_v31 = vld [vmem:[#allocation2 + $0xb98] sm:$0xff]  }
 0x159   :  { %5785 = vmatprep.subr.bf16.mxu1 %v6332_v34  ;;  %v6400_v34 = vld [vmem:[#allocation2 + $0xbd0] sm:$0xff]  }
 0x15a   :  { %5764 = vmatpush3.bf16.msra.mxu0 %v6331_v33  ;;  %v6399_v33 = vld [vmem:[#allocation2 + $0xb10] sm:$0xff]  }
 0x15b   :  { %5793 = vmatprep.subr.bf16.mxu0 %v6337_v38  ;;  %v6404_v38 = vld [vmem:[#allocation2 + $0xbc8] sm:$0xff]  }
 0x15c   :  { %5786 = vmatpush3.bf16.msra.mxu1 %v6336_v37  ;;  %v6403_v37 = vld [vmem:[#allocation2 + $0xb08] sm:$0xff]  }
 0x15d   :  { %4531 = vmatmul.mubr.bf16.vlgmr.msra.gmra.mxu0 %v6333_v35  ;;  %5815 = vmatprep.subr.bf16.mxu1 %v6342_v42  ;;  %v6401_v35 = vld [vmem:[#allocation2 + $0xb90] sm:$0xff]   ;;  %v6408_v42 = vld [vmem:[#allocation2 + $0xbc0] sm:$0xff]  }
 0x15e   :  { %5794 = vmatpush3.bf16.msra.mxu0 %v6341_v41  ;;  %4612 = vmatprep.mubr.bf16.mxu0 %v6373_v8  ;;  %v6407_v41 = vld [vmem:[#allocation2 + $0xb00] sm:$0xff]   ;;  %v6440_v8 = vld [vmem:[#allocation2 + $0xc48] sm:$0xff]  }
 0x15f   :  { %4572 = vmatmul.mubr.bf16.vlgmr.msra.gmra.mxu1 %v6338_v39  ;;  %5795 = vmatprep.subr.bf16.mxu0 %v6344_v44  ;;  %v6405_v39 = vld [vmem:[#allocation2 + $0xb88] sm:$0xff]  }
 0x160   :  { %5816 = vmatpush3.bf16.msra.mxu1 %v6343_v43  ;;  %4653 = vmatprep.mubr.bf16.mxu1 %v6378_v12  ;;  %v6409_v43 = vld [vmem:[%s6908_s0 + $0xb0] ss:$212 sps:$4 sm:$0xff]   ;;  %v6411_v44 = vld [vmem:[%s6908_s0 + $0xb4] ss:$212 sps:$4 sm:$0xff]  }
 0x161   :  { %5817 = vmatprep.subr.bf16.mxu1 %v6346_v46  ;;  %v6413_v46 = vld [vmem:[#allocation2 + $0xc78] sm:$0xff]   ;;  %v6444_v12 = vld [vmem:[#allocation2 + $0xc40] sm:$0xff]  }
 0x162   :  { %5796 = vmatpush3.bf16.msra.mxu0 %v6345_v45  ;;  %v6412_v45 = vld [vmem:[#allocation2 + $0xb80] sm:$0xff]  }
 0x163   :  { %5797 = vmatprep.subr.bf16.mxu0 %v6348_v48  ;;  %v6416_v48 = vld [vmem:[%s6908_s0 + $0xbc] ss:$212 sps:$4 sm:$0xff]  }
 0x164   :  { %5818 = vmatpush3.bf16.msra.mxu1 %v6347_v47  ;;  %v6414_v47 = vld [vmem:[%s6908_s0 + $0xb8] ss:$212 sps:$4 sm:$0xff]  }
 0x165   :  { %5819 = vmatprep.subr.bf16.mxu1 %v6350_v50  ;;  %v6418_v50 = vld [vmem:[#allocation2 + $0xcf8] sm:$0xff]  }
 0x166   :  { %5798 = vmatpush3.bf16.msra.mxu0 %v6349_v49  ;;  %v6417_v49 = vld [vmem:[#allocation2 + $0xc38] sm:$0xff]  }
 0x167   :  { %5799 = vmatprep.subr.bf16.mxu0 %v6352_v52  ;;  %v6420_v52 = vld [vmem:[#allocation2 + $0xc70] sm:$0xff]  }
 0x168   :  { %5820 = vmatpush3.bf16.msra.mxu1 %v6351_v51  ;;  %v6419_v51 = vld [vmem:[#allocation2 + $0xcb8] sm:$0xff]  }
 0x169   :  { %5821 = vmatprep.subr.bf16.mxu1 %v6354_v54  ;;  %v6422_v54 = vld [vmem:[#allocation2 + $0xcf0] sm:$0xff]  }
 0x16a   :  { %5800 = vmatpush3.bf16.msra.mxu0 %v6353_v53  ;;  %v6421_v53 = vld [vmem:[#allocation2 + $0xc30] sm:$0xff]  }
 0x16b   :  { %5801 = vmatprep.subr.bf16.mxu0 %v6356_v56  ;;  %v6424_v56 = vld [vmem:[#allocation2 + $0xc68] sm:$0xff]  }
 0x16c   :  { %5822 = vmatpush3.bf16.msra.mxu1 %v6355_v55  ;;  %v6423_v55 = vld [vmem:[#allocation2 + $0xcb0] sm:$0xff]  }
 0x16d   :  { %5823 = vmatprep.subr.bf16.mxu1 %v6358_v58  ;;  %v6426_v58 = vld [vmem:[#allocation2 + $0xce8] sm:$0xff]  }
 0x16e   :  { %5802 = vmatpush3.bf16.msra.mxu0 %v6357_v57  ;;  %v6425_v57 = vld [vmem:[#allocation2 + $0xc28] sm:$0xff]  }
 0x16f   :  { %5803 = vmatprep.subr.bf16.mxu0 %v6360_v60  ;;  %v6428_v60 = vld [vmem:[#allocation2 + $0xc60] sm:$0xff]  }
 0x170   :  { %5824 = vmatpush3.bf16.msra.mxu1 %v6359_v59  ;;  %v6427_v59 = vld [vmem:[#allocation2 + $0xca8] sm:$0xff]  }
 0x171   :  { %5825 = vmatprep.subr.bf16.mxu1 %v6362_v62  ;;  %v6430_v62 = vld [vmem:[#allocation2 + $0xce0] sm:$0xff]  }
 0x172   :  { %5804 = vmatpush3.bf16.msra.mxu0 %v6361_v61  ;;  %v6429_v61 = vld [vmem:[#allocation2 + $0xc20] sm:$0xff]  }
 0x173   :  { %5805 = vmatprep.subr.bf16.mxu0 %v6364_v0  ;;  %v6432_v0 = vld [vmem:[#allocation2 + $0xc58] sm:$0xff]  }
 0x174   :  { %5826 = vmatpush3.bf16.msra.mxu1 %v6363_v63  ;;  %v6431_v63 = vld [vmem:[#allocation2 + $0xca0] sm:$0xff]  }
 0x175   :  { %5827 = vmatprep.subr.bf16.mxu1 %v6366_v2  ;;  %v6434_v2 = vld [vmem:[#allocation2 + $0xcd8] sm:$0xff]  }
 0x176   :  { %5806 = vmatpush3.bf16.msra.mxu0 %v6365_v1  ;;  %v6433_v1 = vld [vmem:[#allocation2 + $0xc18] sm:$0xff]  }
 0x177   :  { %5807 = vmatprep.subr.bf16.mxu0 %v6368_v4  ;;  %v6436_v4 = vld [vmem:[#allocation2 + $0xc50] sm:$0xff]  }
 0x178   :  { %5828 = vmatpush3.bf16.msra.mxu1 %v6367_v3  ;;  %v6435_v3 = vld [vmem:[#allocation2 + $0xc98] sm:$0xff]  }
 0x179   :  { %5829 = vmatprep.subr.bf16.mxu1 %v6370_v6  ;;  %v6438_v6 = vld [vmem:[#allocation2 + $0xcd0] sm:$0xff]  }
 0x17a   :  { %5808 = vmatpush3.bf16.msra.mxu0 %v6369_v5  ;;  %v6437_v5 = vld [vmem:[#allocation2 + $0xc10] sm:$0xff]  }
 0x17b   :  { %5837 = vmatprep.subr.bf16.mxu0 %v6375_v10  ;;  %v6442_v10 = vld [vmem:[#allocation2 + $0xcc8] sm:$0xff]  }
 0x17c   :  { %5830 = vmatpush3.bf16.msra.mxu1 %v6374_v9  ;;  %v6441_v9 = vld [vmem:[#allocation2 + $0xc08] sm:$0xff]  }
 0x17d   :  { %4613 = vmatmul.mubr.bf16.vlgmr.msra.gmra.mxu0 %v6371_v7  ;;  %5859 = vmatprep.subr.bf16.mxu1 %v6380_v14  ;;  %v6439_v7 = vld [vmem:[#allocation2 + $0xc90] sm:$0xff]   ;;  %v6446_v14 = vld [vmem:[#allocation2 + $0xcc0] sm:$0xff]  }
 0x17e   :  { %5838 = vmatpush3.bf16.msra.mxu0 %v6379_v13  ;;  %4694 = vmatprep.mubr.bf16.mxu0 %v6411_v44  ;;  %v6445_v13 = vld [vmem:[#allocation2 + $0xc00] sm:$0xff]  }
 0x17f   :  { %4654 = vmatmul.mubr.bf16.vlgmr.msra.gmra.mxu1 %v6376_v11  ;;  %5839 = vmatprep.subr.bf16.mxu0 %v6382_v16  ;;  %v6443_v11 = vld [vmem:[#allocation2 + $0xc88] sm:$0xff]   ;;  %v6449_v16 = vld [vmem:[%s6908_s0 + $0xc4] ss:$212 sps:$4 sm:$0xff]  }
 0x180   :  { %5860 = vmatpush3.bf16.msra.mxu1 %v6381_v15  ;;  %4735 = vmatprep.mubr.bf16.mxu1 %v6416_v48  ;;  %v6447_v15 = vld [vmem:[%s6908_s0 + $0xc0] ss:$212 sps:$4 sm:$0xff]  }
 0x181   :  { %5861 = vmatprep.subr.bf16.mxu1 %v6384_v18  ;;  %v6511_v18 = vmov 0.0  }
 0x182   :  { %5840 = vmatpush3.bf16.msra.mxu0 %v6383_v17  ;;  %v6450_v17 = vld [vmem:[#allocation2 + $0xc80] sm:$0xff]  }
 0x183   :  { %5841 = vmatprep.subr.bf16.mxu0 %v6386_v20  ;;  %v6453_v20 = vld [vmem:[%s6908_s0 + $0xcc] ss:$212 sps:$4 sm:$0xff]  }
 0x184   :  { %5862 = vmatpush3.bf16.msra.mxu1 %v6385_v19  ;;  %v6451_v19 = vld [vmem:[%s6908_s0 + $0xc8] ss:$212 sps:$4 sm:$0xff]  }
 0x185   :  { %5863 = vmatprep.subr.bf16.mxu1 %v6388_v22  ;;  %v6455_v22 = vld [vmem:[#allocation2 + $0xd30] sm:$0xff]  }
 0x186   :  { %5842 = vmatpush3.bf16.msra.mxu0 %v6387_v21  ;;  %v6454_v21 = vld [vmem:[#allocation2 + $0xd38] sm:$0xff]  }
 0x187   :  { %5843 = vmatprep.subr.bf16.mxu0 %v6390_v24  ;;  %v6457_v24 = vld [vmem:[#allocation2 + $0xd20] sm:$0xff]  }
 0x188   :  { %5864 = vmatpush3.bf16.msra.mxu1 %v6389_v23  ;;  %v6456_v23 = vld [vmem:[#allocation2 + $0xd28] sm:$0xff]  }
 0x189   :  { %5865 = vmatprep.subr.bf16.mxu1 %v6392_v26  ;;  %v6459_v26 = vld [vmem:[#allocation2 + $0xd10] sm:$0xff]  }
 0x18a   :  { %5844 = vmatpush3.bf16.msra.mxu0 %v6391_v25  ;;  %v6458_v25 = vld [vmem:[#allocation2 + $0xd18] sm:$0xff]  }
 0x18b   :  { %5845 = vmatprep.subr.bf16.mxu0 %v6394_v28  ;;  %v6461_v28 = vld [vmem:[#allocation2 + $0xd00] sm:$0xff]  }
 0x18c   :  { %5866 = vmatpush3.bf16.msra.mxu1 %v6393_v27  ;;  %v6460_v27 = vld [vmem:[#allocation2 + $0xd08] sm:$0xff]  }
 0x18d   :  { %5867 = vmatprep.subr.bf16.mxu1 %v6396_v30  ;;  %v5369_v30 = vpop.f32.mrf.mxu0 }
 0x18e   :  { %5846 = vmatpush3.bf16.msra.mxu0 %v6395_v29  ;;  %v6462_v29 = vld [vmem:[%s6908_s0 + $0xd0] ss:$212 sps:$4 sm:$0xff]  }
 0x18f   :  { %5847 = vmatprep.subr.bf16.mxu0 %v6398_v32  ;;  %v6698_v32 = vpop.f32.mrf.mxu1 }
 0x190   :  { %5868 = vmatpush3.bf16.msra.mxu1 %v6397_v31  ;;  %v5370_v31 = vpop.f32.mrf.mxu0 }
 0x191   :  { %5869 = vmatprep.subr.bf16.mxu1 %v6400_v34  ;;  %v5392_v34 = vpop.f32.mrf.mxu1 }
 0x192   :  { %5848 = vmatpush3.bf16.msra.mxu0 %v6399_v33  ;;  %v6700_v33 = vpop.f32.mrf.mxu0 }
 0x193   :  { %5849 = vmatprep.subr.bf16.mxu0 %v6402_v36  ;;  %v6702_v36 = vpop.f32.mrf.mxu1 }
 0x194   :  { %5870 = vmatpush3.bf16.msra.mxu1 %v6401_v35  ;;  %v5373_v35 = vpop.f32.mrf.mxu0 }
 0x195   :  { %5871 = vmatprep.subr.bf16.mxu1 %v6404_v38  ;;  %v6704_v38 = vpop.f32.mrf.mxu1 }
 0x196   :  { %5850 = vmatpush3.bf16.msra.mxu0 %v6403_v37  ;;  %v5413_v37 = vpop.f32.mrf.mxu0 }
 0x197   :  { %5851 = vmatprep.subr.bf16.mxu0 %v6406_v40  ;;  %v6706_v40 = vpop.f32.mrf.mxu1 }
 0x198   :  { %5872 = vmatpush3.bf16.msra.mxu1 %v6405_v39  ;;  %v5414_v39 = vpop.f32.mrf.mxu0 }
 0x199   :  { %5873 = vmatprep.subr.bf16.mxu1 %v6408_v42  ;;  %v6710_v42 = vpop.f32.mrf.mxu1 }
 0x19a   :  { %5852 = vmatpush3.bf16.msra.mxu0 %v6407_v41  ;;  %v6708_v41 = vpop.f32.mrf.mxu0 }
 0x19b   :  { %5881 = vmatprep.subr.bf16.mxu0 %v6413_v46  ;;  %v6714_v44 = vpop.f32.mrf.mxu1 }
 0x19c   :  { %5874 = vmatpush3.bf16.msra.mxu1 %v6412_v45 }
 0x19d   :  { %4695 = vmatmul.mubr.bf16.vlgmr.msra.gmra.mxu0 %v6409_v43  ;;  %5903 = vmatprep.subr.bf16.mxu1 %v6418_v50  ;;  %v6712_v43 = vpop.f32.mrf.mxu0  ;;  %v6718_v46 = vpop.f32.mrf.mxu1 }
 0x19e   :  { %5882 = vmatpush3.bf16.msra.mxu0 %v6417_v49  ;;  %4776 = vmatprep.mubr.bf16.mxu0 %v6449_v16 }
 0x19f   :  { %4736 = vmatmul.mubr.bf16.vlgmr.msra.gmra.mxu1 %v6414_v47  ;;  %5883 = vmatprep.subr.bf16.mxu0 %v6420_v52  ;;  %v6716_v45 = vpop.f32.mrf.mxu0  ;;  %v6722_v48 = vpop.f32.mrf.mxu1 }
 0x1a0   :  { %5904 = vmatpush3.bf16.msra.mxu1 %v6419_v51  ;;  %4817 = vmatprep.mubr.bf16.mxu1 %v6453_v20 }
 0x1a1   :  { %5905 = vmatprep.subr.bf16.mxu1 %v6422_v54  ;;  %v6720_v47 = vpop.f32.mrf.mxu0  ;;  %v6726_v50 = vpop.f32.mrf.mxu1 }
 0x1a2   :  { %5884 = vmatpush3.bf16.msra.mxu0 %v6421_v53 }
 0x1a3   :  { %5885 = vmatprep.subr.bf16.mxu0 %v6424_v56  ;;  %v6724_v49 = vpop.f32.mrf.mxu0  ;;  %v6730_v52 = vpop.f32.mrf.mxu1 }
 0x1a4   :  { %5906 = vmatpush3.bf16.msra.mxu1 %v6423_v55 }
 0x1a5   :  { %5907 = vmatprep.subr.bf16.mxu1 %v6426_v58  ;;  %v6728_v51 = vpop.f32.mrf.mxu0  ;;  %v6734_v54 = vpop.f32.mrf.mxu1 }
 0x1a6   :  { %5886 = vmatpush3.bf16.msra.mxu0 %v6425_v57 }
 0x1a7   :  { %5887 = vmatprep.subr.bf16.mxu0 %v6428_v60  ;;  %v6732_v53 = vpop.f32.mrf.mxu0  ;;  %v6738_v56 = vpop.f32.mrf.mxu1 }
 0x1a8   :  { %5908 = vmatpush3.bf16.msra.mxu1 %v6427_v59 }
 0x1a9   :  { %5909 = vmatprep.subr.bf16.mxu1 %v6430_v62  ;;  %v6736_v55 = vpop.f32.mrf.mxu0  ;;  %v6742_v58 = vpop.f32.mrf.mxu1 }
 0x1aa   :  { %5888 = vmatpush3.bf16.msra.mxu0 %v6429_v61 }
 0x1ab   :  { %5889 = vmatprep.subr.bf16.mxu0 %v6432_v0  ;;  %v6740_v57 = vpop.f32.mrf.mxu0  ;;  %v6746_v60 = vpop.f32.mrf.mxu1 }
 0x1ac   :  { %5910 = vmatpush3.bf16.msra.mxu1 %v6431_v63 }
 0x1ad   :  { %5911 = vmatprep.subr.bf16.mxu1 %v6434_v2  ;;  %v6744_v59 = vpop.f32.mrf.mxu0  ;;  %v6750_v62 = vpop.f32.mrf.mxu1 }
 0x1ae   :  { %5890 = vmatpush3.bf16.msra.mxu0 %v6433_v1 }
 0x1af   :  { %5891 = vmatprep.subr.bf16.mxu0 %v6436_v4  ;;  %v6748_v61 = vpop.f32.mrf.mxu0  ;;  %v6754_v0 = vpop.f32.mrf.mxu1 }
 0x1b0   :  { %5912 = vmatpush3.bf16.msra.mxu1 %v6435_v3 }
 0x1b1   :  { %5913 = vmatprep.subr.bf16.mxu1 %v6438_v6  ;;  %v6752_v63 = vpop.f32.mrf.mxu0  ;;  %v6758_v2 = vpop.f32.mrf.mxu1 }
 0x1b2   :  { %5892 = vmatpush3.bf16.msra.mxu0 %v6437_v5 }
 0x1b3   :  { %5893 = vmatprep.subr.bf16.mxu0 %v6440_v8  ;;  %v6756_v1 = vpop.f32.mrf.mxu0  ;;  %v6762_v4 = vpop.f32.mrf.mxu1 }
 0x1b4   :  { %5914 = vmatpush3.bf16.msra.mxu1 %v6439_v7 }
 0x1b5   :  { %5915 = vmatprep.subr.bf16.mxu1 %v6442_v10  ;;  %v6760_v3 = vpop.f32.mrf.mxu0  ;;  %v6766_v6 = vpop.f32.mrf.mxu1 }
 0x1b6   :  { %5894 = vmatpush3.bf16.msra.mxu0 %v6441_v9 }
 0x1b7   :  { %5895 = vmatprep.subr.bf16.mxu0 %v6444_v12  ;;  %v6764_v5 = vpop.f32.mrf.mxu0  ;;  %v6770_v8 = vpop.f32.mrf.mxu1 }
 0x1b8   :  { %5916 = vmatpush3.bf16.msra.mxu1 %v6443_v11 }
 0x1b9   :  { %5917 = vmatprep.subr.bf16.mxu1 %v6446_v14  ;;  %v6768_v7 = vpop.f32.mrf.mxu0  ;;  %v6774_v10 = vpop.f32.mrf.mxu1 }
 0x1ba   :  { %5896 = vmatpush3.bf16.msra.mxu0 %v6445_v13 }
 0x1bb   :  { %5934 = vmatprep.subr.bf16.mxu0 %v6511_v18  ;;  %v6772_v9 = vpop.f32.mrf.mxu0  ;;  %v6778_v12 = vpop.f32.mrf.mxu1 }
 0x1bc   :  { %5918 = vmatpush3.bf16.msra.mxu1 %v6450_v17 }
 0x1bd   :  { %4777 = vmatmul.mubr.bf16.vlgmr.msra.gmra.mxu0 %v6447_v15  ;;  %v6776_v11 = vpop.f32.mrf.mxu0  ;;  %v6782_v14 = vpop.f32.mrf.mxu1 }
 0x1be   :  { %5950 = vmatprep.mubr.msk.bf16.mxu0 %vm6512_vm0, %v6511_v18  ;;  %5935 = vmatpush3.bf16.msra.mxu0 %v6454_v21 }
 0x1bf   :  { %4818 = vmatmul.mubr.bf16.vlgmr.msra.gmra.mxu1 %v6451_v19  ;;  %5936 = vmatprep.subr.bf16.mxu0 %v6511_v18  ;;  %v6780_v13 = vpop.f32.mrf.mxu0  ;;  %v6786_v16 = vpop.f32.mrf.mxu1 }
 0x1c1   :  { %v6784_v15 = vpop.f32.mrf.mxu0 }
 0x1c2   :  { %5937 = vmatpush3.bf16.msra.mxu0 %v6455_v22 }
 0x1c3   :  { %5938 = vmatprep.subr.bf16.mxu0 %v6511_v18  ;;  %v6788_v17 = vpop.f32.mrf.mxu0 }
 0x1c4   :  { %6912 = vst [vmem:[#allocation8_spill] sm:$0xff] %v6788_v17 }
 0x1c5   :  { %v6792_v19 = vpop.f32.mrf.mxu0 }
 0x1c6   :  { %5939 = vmatpush3.bf16.msra.mxu0 %v6456_v23  ;;  %6914 = vst [vmem:[#allocation10_spill] sm:$0xff] %v6792_v19 }
 0x1c7   :  { %5940 = vmatprep.subr.bf16.mxu0 %v6511_v18 }
 0x1ca   :  { %5941 = vmatpush3.bf16.msra.mxu0 %v6457_v24 }
 0x1cb   :  { %5942 = vmatprep.subr.bf16.mxu0 %v6511_v18 }
 0x1ce   :  { %5943 = vmatpush3.bf16.msra.mxu0 %v6458_v25 }
 0x1cf   :  { %5944 = vmatprep.subr.bf16.mxu0 %v6511_v18 }
 0x1d2   :  { %5945 = vmatpush3.bf16.msra.mxu0 %v6459_v26 }
 0x1d3   :  { %5946 = vmatprep.subr.bf16.mxu0 %v6511_v18 }
 0x1d6   :  { %5947 = vmatpush3.bf16.msra.mxu0 %v6460_v27  ;;  %v5371_v27 = vadd.f32 %v5370_v31, %v5369_v30  ;;  %v5396_v30 = vadd.f32 %v6704_v38, %v6702_v36 }
 0x1d7   :  { %5948 = vmatprep.subr.bf16.mxu0 %v6511_v18  ;;  %v6790_v18 = vpop.f32.mrf.mxu1 }
 0x1d8   :  { %6913 = vst [vmem:[#allocation9_spill] sm:$0xff] %v6790_v18 }
 0x1d9   :  { %v6794_v20 = vpop.f32.mrf.mxu1 }
 0x1da   :  { %5949 = vmatpush3.bf16.msra.mxu0 %v6461_v28  ;;  %6915 = vst [vmem:[#allocation11_spill] sm:$0xff] %v6794_v20  ;;  %v4875_v28 = vld [vmem:[#allocation4] ss:$0 sm:$0xff]  ;;  %v5393_v20 = vadd.f32 %v5392_v34, %v6698_v32  ;;  %v5437_v32 = vadd.f32 %v6710_v42, %v6706_v40  ;;  %v5481_v40 = vadd.f32 %v6726_v50, %v6722_v48 }
 0x1db   :  { %v6798_v22 = vpop.f32.mrf.mxu1  ;;  %v3795_v19 = vadd.f32 %v5371_v27, %v4875_v28  ;;  %v5506_v50 = vadd.f32 %v6744_v59, %v6740_v57  ;;  %v5550_v57 = vadd.f32 %v6760_v3, %v6756_v1  ;;  %v5591_v59 = vadd.f32 %v6768_v7, %v6764_v5 }
 0x1dc   :  { %6917 = vst [vmem:[#allocation13_spill] sm:$0xff] %v6798_v22  ;;  %v5635_v3 = vadd.f32 %v6784_v15, %v6780_v13 }
 0x1dd   :  { %5951 = vmatmul.mubr.bf16.vlgmr.msra.gmra.mxu0 %v6462_v29  ;;  %v6796_v21 = vpop.f32.mrf.mxu0 }
 0x1de   :  { %6916 = vst [vmem:[#allocation12_spill] sm:$0xff] %v6796_v21  ;;  %v5374_v21 = vadd.f32 %v5373_v35, %v6700_v33  ;;  %v5418_v33 = vadd.f32 %v6712_v43, %v6708_v41  ;;  %v5459_v35 = vadd.f32 %v6720_v47, %v6716_v45  ;;  %v5462_v41 = vadd.f32 %v6728_v51, %v6724_v49 }
 0x1df   :  { %v6800_v23 = vpop.f32.mrf.mxu0  ;;  %v6802_v24 = vpop.f32.mrf.mxu1  ;;  %v5503_v47 = vadd.f32 %v6736_v55, %v6732_v53  ;;  %v5525_v49 = vadd.f32 %v6742_v58, %v6738_v56  ;;  %v5547_v55 = vadd.f32 %v6752_v63, %v6748_v61  ;;  %v5569_v56 = vadd.f32 %v6758_v2, %v6754_v0 }
 0x1e0   :  { %6918 = vst [vmem:[#allocation14_spill] sm:$0xff] %v6800_v23  ;;  %6919 = vst [vmem:[#allocation15_spill] sm:$0xff] %v6802_v24  ;;  %v5415_v23 = vadd.f32 %v5414_v39, %v5413_v37  ;;  %v3836_v24 = vadd.f32 %v5393_v20, %v3795_v19  ;;  %v5440_v19 = vadd.f32 %v6718_v46, %v6714_v44 }
 0x1e1   :  { %v6804_v25 = vpop.f32.mrf.mxu0  ;;  %v6806_v26 = vpop.f32.mrf.mxu1  ;;  %v5484_v44 = vadd.f32 %v6734_v54, %v6730_v52  ;;  %v5528_v52 = vadd.f32 %v6750_v62, %v6746_v60  ;;  %v5572_v60 = vadd.f32 %v6766_v6, %v6762_v4  ;;  %v5594_v0 = vadd.f32 %v6776_v11, %v6772_v9 }
 0x1e2   :  { %6920 = vst [vmem:[#allocation16_spill] sm:$0xff] %v6804_v25  ;;  %v3798_v25 = vadd.f32 %v5374_v21, %v4875_v28  ;;  %v5616_v4 = vadd.f32 %v6782_v14, %v6778_v12 }
 0x1e3   :  { %v6808_v29 = vpop.f32.mrf.mxu0  ;;  %v6810_v17 = vpop.f32.mrf.mxu1 }
 0x1e4   :  { %6921 = vst [vmem:[#allocation17_spill] sm:$0xff] %v6808_v29  ;;  %6922 = vst [vmem:[#allocation18_spill] sm:$0xff] %v6810_v17  ;;  %v3877_v17 = vadd.f32 %v5415_v23, %v3836_v24  ;;  %v3839_v34 = vadd.f32 %v5396_v30, %v3798_v25 }
 0x1e5   :  { %v6816_v18 = vpop.f32.mrf.mxu1 }
 0x1e6   :  { %v3918_v36 = vadd.f32 %v5437_v32, %v3877_v17  ;;  %v3880_v38 = vadd.f32 %v5418_v33, %v3839_v34 }
 0x1e8   :  { %v3959_v20 = vadd.f32 %v5459_v35, %v3918_v36  ;;  %v3921_v45 = vadd.f32 %v5440_v19, %v3880_v38  ;;  %v5613_v35 = vadd.f32 %v6774_v10, %v6770_v8  ;;  %v6923_v19 = vld [vmem:[#allocation9_spill] sm:$0xff]  ;;  %v6924_v8 = vld [vmem:[#allocation8_spill] sm:$0xff]  ;;  %v6925_v10 = vld [vmem:[#allocation10_spill] sm:$0xff] }
 0x1ea   :  { %v4000_v21 = vadd.f32 %v5481_v40, %v3959_v20  ;;  %v3962_v23 = vadd.f32 %v5462_v41, %v3921_v45  ;;  %v5657_v20 = vadd.f32 %v6923_v19, %v6786_v16  ;;  %v5638_v40 = vadd.f32 %v6925_v10, %v6924_v8  ;;  %v6926_v45 = vld [vmem:[#allocation12_spill] sm:$0xff] }
 0x1ec   :  { %v4041_v48 = vadd.f32 %v5503_v47, %v4000_v21  ;;  %v4003_v53 = vadd.f32 %v5484_v44, %v3962_v23  ;;  %v6927_v47 = vld [vmem:[#allocation14_spill] sm:$0xff]  ;;  %v6928_v23 = vld [vmem:[#allocation11_spill] sm:$0xff]  ;;  %v6929_v44 = vld [vmem:[#allocation13_spill] sm:$0xff] }
 0x1ed   :  { %v5679_v13 = vadd.f32 %v6927_v47, %v6926_v45 }
 0x1ee   :  { %v4082_v25 = vadd.f32 %v5525_v49, %v4041_v48  ;;  %v4044_v27 = vadd.f32 %v5506_v50, %v4003_v53  ;;  %v5660_v48 = vadd.f32 %v6929_v44, %v6928_v23  ;;  %v6930_v50 = vld [vmem:[#allocation15_spill] sm:$0xff]  ;;  %v6931_v53 = vld [vmem:[#allocation16_spill] sm:$0xff] }
 0x1ef   :  { %v5701_v16 = vadd.f32 %v6806_v26, %v6930_v50 }
 0x1f0   :  { %v4123_v30 = vadd.f32 %v5547_v55, %v4082_v25  ;;  %v4085_v58 = vadd.f32 %v5528_v52, %v4044_v27  ;;  %v6932_v55 = vld [vmem:[#allocation17_spill] sm:$0xff] }
 0x1f1   :  { %v5682_v25 = vadd.f32 %v6932_v55, %v6931_v53 }
 0x1f2   :  { %v4164_v63 = vadd.f32 %v5569_v56, %v4123_v30  ;;  %v4126_v33 = vadd.f32 %v5550_v57, %v4085_v58 }
 0x1f4   :  { %v4205_v34 = vadd.f32 %v5591_v59, %v4164_v63  ;;  %v4167_v2 = vadd.f32 %v5572_v60, %v4126_v33  ;;  %v6933_v59 = vld [vmem:[#allocation18_spill] sm:$0xff] }
 0x1f5   :  { %v5704_v63 = vadd.f32 %v6816_v18, %v6933_v59 }
 0x1f6   :  { %v4246_v36 = vadd.f32 %v5613_v35, %v4205_v34  ;;  %v4208_v38 = vadd.f32 %v5594_v0, %v4167_v2 }
 0x1f8   :  { %v4287_v6 = vadd.f32 %v5635_v3, %v4246_v36  ;;  %v4249_v41 = vadd.f32 %v5616_v4, %v4208_v38 }
 0x1fa   :  { %v4328_v15 = vadd.f32 %v5657_v20, %v4287_v6  ;;  %v4290_v21 = vadd.f32 %v5638_v40, %v4249_v41 }
 0x1fc   :  { %v4369_v14 = vadd.f32 %v5679_v13, %v4328_v15  ;;  %v4331_v52 = vadd.f32 %v5660_v48, %v4290_v21 }
 0x1fd   :  { %v6814_v22 = vpop.f32.mrf.mxu0 }
 0x1fe   :  { %v4410_v57 = vadd.f32 %v5701_v16, %v4369_v14  ;;  %v4372_v58 = vadd.f32 %v5682_v25, %v4331_v52 }
 0x1ff   :  { %v6820_v31 = vpop.f32.mrf.mxu0  ;;  %v6822_v29 = vpop.f32.mrf.mxu1 }
 0x200   :  { %v5723_v30 = vadd.f32 %v6820_v31, %v6814_v22  ;;  %v4413_v0 = vadd.f32 %v5704_v63, %v4372_v58 }
 0x201   :  { %v6830_v37 = vpop.f32.mrf.mxu0  ;;  %v6832_v39 = vpop.f32.mrf.mxu1 }
 0x202   :  { %v4451_v34 = vadd.f32 %v5723_v30, %v4410_v57  ;;  %v5745_v26 = vadd.f32 %v6832_v39, %v6822_v29 }
 0x203   :  { %v6840_v42 = vpop.f32.mrf.mxu0  ;;  %v6842_v43 = vpop.f32.mrf.mxu1 }
 0x204   :  { %v5726_v35 = vadd.f32 %v6840_v42, %v6830_v37  ;;  %v4492_v31 = vadd.f32 %v5745_v26, %v4451_v34 }
 0x205   :  { %v6850_v46 = vpop.f32.mrf.mxu1 }
 0x206   :  { %v4454_v36 = vadd.f32 %v5726_v35, %v4413_v0  ;;  %v5748_v38 = vadd.f32 %v6850_v46, %v6842_v43 }
 0x208   :  { %v4495_v29 = vadd.f32 %v5748_v38, %v4454_v36 }
 0x21d   :  { %v6846_v17 = vpop.f32.mrf.mxu0 }
 0x21f   :  { %v5766_v51 = vpop.f32.mrf.mxu0  ;;  %v6856_v24 = vpop.f32.mrf.mxu1 }
 0x220   :  { %v5767_v2 = vadd.f32 %v5766_v51, %v6846_v17 }
 0x221   :  { %v5768_v54 = vpop.f32.mrf.mxu0  ;;  %v5788_v28 = vpop.f32.mrf.mxu1 }
 0x222   :  { %v4533_v18 = vadd.f32 %v5767_v2, %v4492_v31  ;;  %v5789_v4 = vadd.f32 %v5788_v28, %v6856_v24 }
 0x223   :  { %v5769_v32 = vpop.f32.mrf.mxu0  ;;  %v5790_v61 = vpop.f32.mrf.mxu1 }
 0x224   :  { %v5770_v6 = vadd.f32 %v5769_v32, %v5768_v54  ;;  %v4574_v37 = vadd.f32 %v5789_v4, %v4533_v18 }
 0x225   :  { %v5791_v1 = vpop.f32.mrf.mxu1 }
 0x226   :  { %v4536_v42 = vadd.f32 %v5770_v6, %v4495_v29  ;;  %v5792_v10 = vadd.f32 %v5791_v1, %v5790_v61 }
 0x228   :  { %v4577_v13 = vadd.f32 %v5792_v10, %v4536_v42 }
 0x23d   :  { %v5809_v62 = vpop.f32.mrf.mxu0 }
 0x23f   :  { %v5810_v5 = vpop.f32.mrf.mxu0  ;;  %v5831_v7 = vpop.f32.mrf.mxu1 }
 0x240   :  { %v5811_v39 = vadd.f32 %v5810_v5, %v5809_v62 }
 0x241   :  { %v5812_v9 = vpop.f32.mrf.mxu0  ;;  %v5832_v11 = vpop.f32.mrf.mxu1 }
 0x242   :  { %v4615_v51 = vadd.f32 %v5811_v39, %v4574_v37  ;;  %v5833_v40 = vadd.f32 %v5832_v11, %v5831_v7 }
 0x243   :  { %v5813_v49 = vpop.f32.mrf.mxu0  ;;  %v5834_v12 = vpop.f32.mrf.mxu1 }
 0x244   :  { %v5814_v41 = vadd.f32 %v5813_v49, %v5812_v9  ;;  %v4656_v46 = vadd.f32 %v5833_v40, %v4615_v51 }
 0x245   :  { %v5835_v56 = vpop.f32.mrf.mxu1 }
 0x246   :  { %v4618_v15 = vadd.f32 %v5814_v41, %v4577_v13  ;;  %v5836_v24 = vadd.f32 %v5835_v56, %v5834_v12 }
 0x248   :  { %v4659_v5 = vadd.f32 %v5836_v24, %v4618_v15 }
 0x25d   :  { %v5853_v27 = vpop.f32.mrf.mxu0 }
 0x25f   :  { %v5854_v33 = vpop.f32.mrf.mxu0  ;;  %v5875_v60 = vpop.f32.mrf.mxu1 }
 0x260   :  { %v5855_v43 = vadd.f32 %v5854_v33, %v5853_v27 }
 0x261   :  { %v5856_v3 = vpop.f32.mrf.mxu0  ;;  %v5876_v22 = vpop.f32.mrf.mxu1 }
 0x262   :  { %v4697_v32 = vadd.f32 %v5855_v43, %v4656_v46  ;;  %v5877_v21 = vadd.f32 %v5876_v22, %v5875_v60 }
 0x263   :  { %v5857_v19 = vpop.f32.mrf.mxu0  ;;  %v5878_v20 = vpop.f32.mrf.mxu1 }
 0x264   :  { %v5858_v62 = vadd.f32 %v5857_v19, %v5856_v3  ;;  %v4738_v1 = vadd.f32 %v5877_v21, %v4697_v32 }
 0x265   :  { %v5879_v17 = vpop.f32.mrf.mxu1 }
 0x266   :  { %v4700_v48 = vadd.f32 %v5858_v62, %v4659_v5  ;;  %v5880_v7 = vadd.f32 %v5879_v17, %v5878_v20 }
 0x268   :  { %v4741_v50 = vadd.f32 %v5880_v7, %v4700_v48 }
 0x27d   :  { %v5897_v8 = vpop.f32.mrf.mxu0 }
 0x27f   :  { %v5898_v45 = vpop.f32.mrf.mxu0  ;;  %v5919_v47 = vpop.f32.mrf.mxu1 }
 0x280   :  { %v5899_v23 = vadd.f32 %v5898_v45, %v5897_v8 }
 0x281   :  { %v5900_v54 = vpop.f32.mrf.mxu0  ;;  %v5920_v28 = vpop.f32.mrf.mxu1 }
 0x282   :  { %v4779_v9 = vadd.f32 %v5899_v23, %v4738_v1  ;;  %v5921_v11 = vadd.f32 %v5920_v28, %v5919_v47 }
 0x283   :  { %v5901_v44 = vpop.f32.mrf.mxu0  ;;  %v5922_v61 = vpop.f32.mrf.mxu1 }
 0x284   :  { %v5902_v49 = vadd.f32 %v5901_v44, %v5900_v54  ;;  %v4820_v12 = vadd.f32 %v5921_v11, %v4779_v9 }
 0x285   :  { %v5923_v14 = vpop.f32.mrf.mxu1 }
 0x286   :  { %v4782_v16 = vadd.f32 %v5902_v49, %v4741_v50  ;;  %v5924_v53 = vadd.f32 %v5923_v14, %v5922_v61 }
 0x288   :  { %v4823_v52 = vadd.f32 %v5924_v53, %v4782_v16 }
 0x29d   :  { %v4860_v55 = vpop.f32.mrf.mxu0 }
 0x29e   :  { %v4861_v25 = vadd.f32 %v4860_v55, %v4820_v12 }
 0x29f   :  { %v5952_v27 = vpop.f32.mrf.mxu0 }
 0x2a0   :  { %4867 = vst [vmem:[%s6911_s3] sm:$0xff] %v4861_v25 }
 0x2a1   :  { %v4863_v30 = vpop.f32.mrf.mxu0 }
 0x2a2   :  { %v4864_v56 = vadd.f32 %v4863_v30, %v4823_v52 }
 0x2a3   :  { %v5953_v57 = vpop.f32.mrf.mxu0 }
 0x2a4   :  { %4868 = vst [vmem:[%s6911_s3 + $0x8] sm:$0xff] %v4864_v56 }
 0x2a5   :  { %4873 = vsyncpa [#allocation3], 1 }
 0x2a6   :  { %4874 = vsyncpa [#allocation5], 1 }

</bundles_post_ra>
